<compile_context>
chip_gen: v7x
topology: tpu7x:2x2x1
jax: 0.10.0
libtpu: 0.0.40
codegen_flags: <defaults>
</compile_context>

<pallas_src>
import functools

import jax
import jax.numpy as jnp
from jax.experimental import pallas as pl
from jax.experimental.pallas import tpu as pltpu


# ----------------------------------------------------------------------------
# The single fused kernel: input MLP + all GRU layers + VAE head.
# All activations live in VMEM / vregs; the serial critical path per timestep
# is one (B,H)@(H,3H) MXU pass plus the gate nonlinearities.
# ----------------------------------------------------------------------------
def _evae_fused_kernel(*refs, num_layers, seq_len, batch, hidden):
    if num_layers > 1:
        (x_ref, w_in_ref, b_in_ref, w_ih0_ref, b_ih0_ref,
         w_ihr_ref, b_ihr_ref, w_hh_ref, b_hh_ref,
         w_enc_ref, b_enc_ref, eps_ref,
         z_ref, zl_ref) = refs
    else:
        (x_ref, w_in_ref, b_in_ref, w_ih0_ref, b_ih0_ref,
         w_hh_ref, b_hh_ref,
         w_enc_ref, b_enc_ref, eps_ref,
         z_ref, zl_ref) = refs
        w_ihr_ref = b_ihr_ref = None

    T, B, H = seq_len, batch, hidden
    f32 = jnp.float32

    # ---- input Linear + leaky_relu (time-parallel, one MXU pass) ----
    x = x_ref[...].astype(jnp.bfloat16)                          # (T*B, Din)
    emb = jnp.dot(x, w_in_ref[...], preferred_element_type=f32) + b_in_ref[...]
    emb = jnp.where(emb > 0, emb, 0.01 * emb)                    # F.leaky_relu (f32)

    layer_in = emb.astype(jnp.bfloat16)                          # (T*B, E)

    # ---- GRU layers ----
    for layer in range(num_layers):
        if layer == 0:
            w_ih = w_ih0_ref[...]                                # (E, 3H) bf16
            b_ih = b_ih0_ref[...]                                # (1, 3H) f32
        else:
            w_ih = w_ihr_ref[layer - 1]                          # (H, 3H) bf16
            b_ih = b_ihr_ref[layer - 1]                          # (1, 3H) f32
        w_hh = w_hh_ref[layer]                                   # (H, 3H) bf16
        b_hh = b_hh_ref[layer]                                   # (1, 3H) f32

        # Time-parallel input-gate pre-activations: one MXU pass for all
        # timesteps, batch rows and the three gates (off the serial path).
        gi = jnp.dot(layer_in, w_ih, preferred_element_type=f32) + b_ih

        # Hoist recurrent r/z biases into the pre-activations; b_hn stays
        # inside r*(...) as in PyTorch's GRU.
        gi_r = gi[:, 0:H] + b_hh[:, 0:H]
        gi_z = gi[:, H:2 * H] + b_hh[:, H:2 * H]
        gi_n = gi[:, 2 * H:3 * H]
        b_hn = b_hh[:, 2 * H:3 * H]

        # Serial recurrence (static unroll; T is small). One concatenated
        # (B,H)@(H,3H) matmul per step, static lane slices for r/z/n.
        h = jnp.zeros((B, H), f32)                               # hidden=None -> zeros
        outs = []
        for t in range(T):
            gh = jnp.dot(h.astype(jnp.bfloat16), w_hh,
                         preferred_element_type=f32)             # (B, 3H)
            r = jax.nn.sigmoid(gi_r[t * B:(t + 1) * B] + gh[:, 0:H])
            u = jax.nn.sigmoid(gi_z[t * B:(t + 1) * B] + gh[:, H:2 * H])
            n = jnp.tanh(gi_n[t * B:(t + 1) * B]
                         + r * (gh[:, 2 * H:3 * H] + b_hn))
            h = (1.0 - u) * n + u * h
            outs.append(h)

        # Full output sequence of this layer, time-major rows (t, b).
        layer_in = jnp.concatenate(outs, axis=0).astype(jnp.bfloat16)  # (T*B, H)

    # ---- VAE head: one MXU pass + vectorized EUP ops over the whole seq ----
    logl = jnp.dot(layer_in, w_enc_ref[...],
                   preferred_element_type=f32) + b_enc_ref[...]  # (T*B, O)
    zl = jnp.exp(logl)                                           # z_lambda
    # z = -log(1-eps) / z_lambda, with the divide folded into one exp(-logl);
    # -log1p(-eps) is independent of the recurrence (off the critical path).
    z = (-jnp.log1p(-eps_ref[...])) * jnp.exp(-logl)             # (T*B, O)

    # ---- lane-dense, batch-first output assembly: (B, T*O) ----
    z_ref[...] = jnp.concatenate(
        [z[t * B:(t + 1) * B] for t in range(T)], axis=-1)
    zl_ref[...] = jnp.concatenate(
        [zl[t * B:(t + 1) * B] for t in range(T)], axis=-1)

    # TODO(synk): self.output (Linear-ReLU-Linear) is defined in __init__ but
    # never used in forward(), so it is intentionally not implemented.
    # TODO(synk): the pack_padded_sequence path (pack=True) is not implemented.


def _full_block(a):
    nd = a.ndim
    return pl.BlockSpec(a.shape, lambda i, _nd=nd: (0,) * _nd)


def evae_fused_call(params, x_tm, eps_tm, *, num_layers, seq_len, batch,
                    hidden, out_size):
    args = [x_tm, params["w_in"], params["b_in"],
            params["w_ih0"], params["b_ih0"]]
    if num_layers > 1:
        args += [params["w_ih_rest"], params["b_ih_rest"]]
    args += [params["w_hh"], params["b_hh"],
             params["w_enc"], params["b_enc"], eps_tm]

    kernel = functools.partial(_evae_fused_kernel, num_layers=num_layers,
                               seq_len=seq_len, batch=batch, hidden=hidden)
    out_cols = seq_len * out_size
    out_sds = jax.ShapeDtypeStruct((batch, out_cols), jnp.float32)
    return pl.pallas_call(
        kernel,
        out_shape=(out_sds, out_sds),
        grid=(1,),
        in_specs=[_full_block(a) for a in args],
        out_specs=(
            pl.BlockSpec((batch, out_cols), lambda i: (0, 0)),
            pl.BlockSpec((batch, out_cols), lambda i: (0, 0)),
        ),
        compiler_params=pltpu.CompilerParams(
            dimension_semantics=("arbitrary",)),
    )(*args)


# ----------------------------------------------------------------------------
# Parameter construction (deterministic, xavier-uniform like the module).
# GRU weights stored transposed (in, 3H) with gate columns [r | z | n];
# Linear weights stored transposed (in, out).  bf16 matmul operands,
# f32 biases.
# ----------------------------------------------------------------------------
def xavier_uniform(key, shape, gain, dtype=jnp.float32):
    fan_in, fan_out = shape[-2], shape[-1]
    a = gain * (6.0 / (fan_in + fan_out)) ** 0.5
    return jax.random.uniform(key, shape, jnp.float32, -a, a).astype(dtype)


def make_params(key, input_size, emb, hidden, num_layers, out_size):
    ks = jax.random.split(key, 6)
    relu_gain = 2.0 ** 0.5            # nn.init.calculate_gain('relu')
    sig_gain = 1.0                    # nn.init.calculate_gain('sigmoid')
    p = {
        "w_in": xavier_uniform(ks[0], (input_size, emb), relu_gain, jnp.bfloat16),
        "b_in": jnp.zeros((1, emb), jnp.float32),
        "w_enc": xavier_uniform(ks[1], (hidden, out_size), relu_gain, jnp.bfloat16),
        "b_enc": jnp.zeros((1, out_size), jnp.float32),
        "w_ih0": xavier_uniform(ks[2], (emb, 3 * hidden), sig_gain, jnp.bfloat16),
        "b_ih0": jnp.full((1, 3 * hidden), 0.25, jnp.float32),        # constant(0.25)
        "w_hh": xavier_uniform(ks[3], (num_layers, hidden, 3 * hidden),
                               sig_gain, jnp.bfloat16),
        "b_hh": jnp.full((num_layers, 1, 3 * hidden), 0.25, jnp.float32),
    }
    if num_layers > 1:
        p["w_ih_rest"] = xavier_uniform(
            ks[4], (num_layers - 1, hidden, 3 * hidden), sig_gain, jnp.bfloat16)
        p["b_ih_rest"] = jnp.full((num_layers - 1, 1, 3 * hidden), 0.25,
                                  jnp.float32)
    return p


# ----------------------------------------------------------------------------
# Full forward
# ----------------------------------------------------------------------------
def evae_forward(params, input_raw, eps_key):
    B, T, Din = input_raw.shape
    H = params["w_hh"].shape[-1] // 3
    L = params["w_hh"].shape[0]
    O = params["w_enc"].shape[1]

    # Single XLA transpose of the *raw input* (smallest activation) to
    # time-major rows; everything downstream lives inside the fused kernel.
    x_tm = jnp.transpose(input_raw, (1, 0, 2)).reshape(T * B, Din)

    # eps ~ U[0,1) (torch.rand equivalent), generated directly in the kernel's
    # time-major row layout.
    eps_tm = jax.random.uniform(eps_key, (T * B, O), jnp.float32)

    z_slab, zl_slab = evae_fused_call(
        params, x_tm, eps_tm,
        num_layers=L, seq_len=T, batch=B, hidden=H, out_size=O)

    # Outputs come back batch-first and lane-dense as (B, T*O); the reshape to
    # PyTorch's (B, T, O) is a free row-major view.
    z = z_slab.reshape(B, T, O)
    z_lambda = zl_slab.reshape(B, T, O)
    return z, z_lambda


if __name__ == "__main__":
    # Small shapes consistent with the module's forward.
    B, T = 2, 8
    input_size = 16
    low_embedding_size = 32
    GRU_hidden_size = 32
    num_layers = 2
    output_size_to_edge_level = 16

    key = jax.random.PRNGKey(0)
    k_param, k_x, k_eps = jax.random.split(key, 3)

    params = make_params(k_param, input_size, low_embedding_size,
                         GRU_hidden_size, num_layers, output_size_to_edge_level)
    input_raw = jax.random.normal(k_x, (B, T, input_size), jnp.float32)

    fwd = jax.jit(evae_forward)
    z, z_lambda = fwd(params, input_raw, k_eps)
    jax.block_until_ready((z, z_lambda))

    assert z.shape == (B, T, output_size_to_edge_level)
    assert z_lambda.shape == (B, T, output_size_to_edge_level)
    assert bool(jnp.all(jnp.isfinite(z))) and bool(jnp.all(jnp.isfinite(z_lambda)))
    assert bool(jnp.all(z_lambda > 0)) and bool(jnp.all(z >= 0))
    print("KERNEL_OK")
</pallas_src>

<mosaic_0001>
module attributes {stable_mosaic.version = 11 : i64} {
  func.func @_evae_fused_kernel(%arg0: i32, %arg1: memref<16x16xf32, #tpu.memory_space<vmem>>, %arg2: memref<16x32xbf16, #tpu.memory_space<vmem>>, %arg3: memref<1x32xf32, #tpu.memory_space<vmem>>, %arg4: memref<32x96xbf16, #tpu.memory_space<vmem>>, %arg5: memref<1x96xf32, #tpu.memory_space<vmem>>, %arg6: memref<1x32x96xbf16, #tpu.memory_space<vmem>>, %arg7: memref<1x1x96xf32, #tpu.memory_space<vmem>>, %arg8: memref<2x32x96xbf16, #tpu.memory_space<vmem>>, %arg9: memref<2x1x96xf32, #tpu.memory_space<vmem>>, %arg10: memref<32x16xbf16, #tpu.memory_space<vmem>>, %arg11: memref<1x16xf32, #tpu.memory_space<vmem>>, %arg12: memref<16x16xf32, #tpu.memory_space<vmem>>, %arg13: memref<2x128xf32, #tpu.memory_space<vmem>>, %arg14: memref<2x128xf32, #tpu.memory_space<vmem>>) attributes {dimension_semantics = [#tpu.dimension_semantics<arbitrary>], iteration_bounds = array<i64: 1>, scalar_prefetch = 0 : i64, scratch_operands = 0 : i64, tpu.core_type = #tpu.core_type<tc>, window_params = [{pipeline_mode = #tpu.pipeline_mode<synchronous>, transform_indices = @transform_0, window_bounds = array<i64: 16, 16>}, {pipeline_mode = #tpu.pipeline_mode<synchronous>, transform_indices = @transform_1, window_bounds = array<i64: 16, 32>}, {pipeline_mode = #tpu.pipeline_mode<synchronous>, transform_indices = @transform_2, window_bounds = array<i64: 1, 32>}, {pipeline_mode = #tpu.pipeline_mode<synchronous>, transform_indices = @transform_3, window_bounds = array<i64: 32, 96>}, {pipeline_mode = #tpu.pipeline_mode<synchronous>, transform_indices = @transform_4, window_bounds = array<i64: 1, 96>}, {pipeline_mode = #tpu.pipeline_mode<synchronous>, transform_indices = @transform_5, window_bounds = array<i64: 1, 32, 96>}, {pipeline_mode = #tpu.pipeline_mode<synchronous>, transform_indices = @transform_6, window_bounds = array<i64: 1, 1, 96>}, {pipeline_mode = #tpu.pipeline_mode<synchronous>, transform_indices = @transform_7, window_bounds = array<i64: 2, 32, 96>}, {pipeline_mode = #tpu.pipeline_mode<synchronous>, transform_indices = @transform_8, window_bounds = array<i64: 2, 1, 96>}, {pipeline_mode = #tpu.pipeline_mode<synchronous>, transform_indices = @transform_9, window_bounds = array<i64: 32, 16>}, {pipeline_mode = #tpu.pipeline_mode<synchronous>, transform_indices = @transform_10, window_bounds = array<i64: 1, 16>}, {pipeline_mode = #tpu.pipeline_mode<synchronous>, transform_indices = @transform_11, window_bounds = array<i64: 16, 16>}, {pipeline_mode = #tpu.pipeline_mode<synchronous>, transform_indices = @transform_12, window_bounds = array<i64: 2, 128>}, {pipeline_mode = #tpu.pipeline_mode<synchronous>, transform_indices = @transform_13, window_bounds = array<i64: 2, 128>}]} {
    %c0 = arith.constant 0 : index
    %c0_0 = arith.constant 0 : index
    %0 = vector.load %arg1[%c0, %c0_0] : memref<16x16xf32, #tpu.memory_space<vmem>>, vector<16x16xf32>
    %1 = arith.truncf %0 : vector<16x16xf32> to vector<16x16xbf16>
    %c0_1 = arith.constant 0 : index
    %c0_2 = arith.constant 0 : index
    %2 = vector.load %arg2[%c0_1, %c0_2] : memref<16x32xbf16, #tpu.memory_space<vmem>>, vector<16x32xbf16>
    %cst = arith.constant dense<0.000000e+00> : vector<16x32xf32>
    %3 = tpu.matmul %1, %2, %cst {dimension_numbers = #tpu.dot_dimension_numbers<[1], [0], [0], [1], [0, 0, 1, 1], [], []>} : vector<16x16xbf16>, vector<16x32xbf16>, vector<16x32xf32> -> vector<16x32xf32>
    %c0_3 = arith.constant 0 : index
    %c0_4 = arith.constant 0 : index
    %4 = vector.load %arg3[%c0_3, %c0_4] : memref<1x32xf32, #tpu.memory_space<vmem>>, vector<1x32xf32>
    %5 = vector.broadcast %4 : vector<1x32xf32> to vector<16x32xf32>
    %6 = arith.addf %3, %5 : vector<16x32xf32>
    %cst_5 = arith.constant 0.000000e+00 : f32
    %7 = vector.broadcast %cst_5 : f32 to vector<16x32xf32>
    %8 = arith.cmpf ogt, %6, %7 : vector<16x32xf32>
    %cst_6 = arith.constant 0.00999999977 : f32
    %9 = vector.broadcast %cst_6 : f32 to vector<16x32xf32>
    %10 = arith.mulf %9, %6 : vector<16x32xf32>
    %11 = arith.select %8, %6, %10 : vector<16x32xi1>, vector<16x32xf32>
    %12 = arith.truncf %11 : vector<16x32xf32> to vector<16x32xbf16>
    %c0_7 = arith.constant 0 : index
    %c0_8 = arith.constant 0 : index
    %13 = vector.load %arg4[%c0_7, %c0_8] : memref<32x96xbf16, #tpu.memory_space<vmem>>, vector<32x96xbf16>
    %c0_9 = arith.constant 0 : index
    %c0_10 = arith.constant 0 : index
    %14 = vector.load %arg5[%c0_9, %c0_10] : memref<1x96xf32, #tpu.memory_space<vmem>>, vector<1x96xf32>
    %c0_11 = arith.constant 0 : index
    %c0_12 = arith.constant 0 : index
    %c0_13 = arith.constant 0 : index
    %15 = vector.load %arg8[%c0_11, %c0_12, %c0_13] : memref<2x32x96xbf16, #tpu.memory_space<vmem>>, vector<1x32x96xbf16>
    %16 = vector.shape_cast %15 : vector<1x32x96xbf16> to vector<32x96xbf16>
    %c0_14 = arith.constant 0 : index
    %c0_15 = arith.constant 0 : index
    %c0_16 = arith.constant 0 : index
    %17 = vector.load %arg9[%c0_14, %c0_15, %c0_16] : memref<2x1x96xf32, #tpu.memory_space<vmem>>, vector<1x1x96xf32>
    %18 = vector.shape_cast %17 : vector<1x1x96xf32> to vector<1x96xf32>
    %cst_17 = arith.constant dense<0.000000e+00> : vector<16x96xf32>
    %19 = tpu.matmul %12, %13, %cst_17 {dimension_numbers = #tpu.dot_dimension_numbers<[1], [0], [0], [1], [0, 0, 1, 1], [], []>} : vector<16x32xbf16>, vector<32x96xbf16>, vector<16x96xf32> -> vector<16x96xf32>
    %20 = vector.broadcast %14 : vector<1x96xf32> to vector<16x96xf32>
    %21 = arith.addf %19, %20 : vector<16x96xf32>
    %22 = vector.extract_strided_slice %21 {offsets = [0, 0], sizes = [16, 32], strides = [1, 1]} : vector<16x96xf32> to vector<16x32xf32>
    %23 = vector.extract_strided_slice %18 {offsets = [0, 0], sizes = [1, 32], strides = [1, 1]} : vector<1x96xf32> to vector<1x32xf32>
    %24 = vector.broadcast %23 : vector<1x32xf32> to vector<16x32xf32>
    %25 = arith.addf %22, %24 : vector<16x32xf32>
    %26 = vector.extract_strided_slice %21 {offsets = [0, 32], sizes = [16, 32], strides = [1, 1]} : vector<16x96xf32> to vector<16x32xf32>
    %27 = vector.extract_strided_slice %18 {offsets = [0, 32], sizes = [1, 32], strides = [1, 1]} : vector<1x96xf32> to vector<1x32xf32>
    %28 = vector.broadcast %27 : vector<1x32xf32> to vector<16x32xf32>
    %29 = arith.addf %26, %28 : vector<16x32xf32>
    %30 = vector.extract_strided_slice %21 {offsets = [0, 64], sizes = [16, 32], strides = [1, 1]} : vector<16x96xf32> to vector<16x32xf32>
    %31 = vector.extract_strided_slice %18 {offsets = [0, 64], sizes = [1, 32], strides = [1, 1]} : vector<1x96xf32> to vector<1x32xf32>
    %cst_18 = arith.constant 0.000000e+00 : f32
    %32 = vector.broadcast %cst_18 : f32 to vector<2x32xf32>
    %33 = arith.truncf %32 : vector<2x32xf32> to vector<2x32xbf16>
    %cst_19 = arith.constant dense<0.000000e+00> : vector<2x96xf32>
    %34 = tpu.matmul %33, %16, %cst_19 {dimension_numbers = #tpu.dot_dimension_numbers<[1], [0], [0], [1], [0, 0, 1, 1], [], []>} : vector<2x32xbf16>, vector<32x96xbf16>, vector<2x96xf32> -> vector<2x96xf32>
    %35 = vector.extract_strided_slice %25 {offsets = [0, 0], sizes = [2, 32], strides = [1, 1]} : vector<16x32xf32> to vector<2x32xf32>
    %36 = vector.extract_strided_slice %34 {offsets = [0, 0], sizes = [2, 32], strides = [1, 1]} : vector<2x96xf32> to vector<2x32xf32>
    %37 = arith.addf %35, %36 : vector<2x32xf32>
    %38 = arith.negf %37 : vector<2x32xf32>
    %39 = math.exp %38 : vector<2x32xf32>
    %cst_20 = arith.constant 1.000000e+00 : f32
    %40 = vector.broadcast %cst_20 : f32 to vector<2x32xf32>
    %41 = arith.addf %40, %39 : vector<2x32xf32>
    %42 = arith.divf %40, %41 : vector<2x32xf32>
    %43 = vector.extract_strided_slice %29 {offsets = [0, 0], sizes = [2, 32], strides = [1, 1]} : vector<16x32xf32> to vector<2x32xf32>
    %44 = vector.extract_strided_slice %34 {offsets = [0, 32], sizes = [2, 32], strides = [1, 1]} : vector<2x96xf32> to vector<2x32xf32>
    %45 = arith.addf %43, %44 : vector<2x32xf32>
    %46 = arith.negf %45 : vector<2x32xf32>
    %47 = math.exp %46 : vector<2x32xf32>
    %cst_21 = arith.constant 1.000000e+00 : f32
    %48 = vector.broadcast %cst_21 : f32 to vector<2x32xf32>
    %49 = arith.addf %48, %47 : vector<2x32xf32>
    %50 = arith.divf %48, %49 : vector<2x32xf32>
    %51 = vector.extract_strided_slice %30 {offsets = [0, 0], sizes = [2, 32], strides = [1, 1]} : vector<16x32xf32> to vector<2x32xf32>
    %52 = vector.extract_strided_slice %34 {offsets = [0, 64], sizes = [2, 32], strides = [1, 1]} : vector<2x96xf32> to vector<2x32xf32>
    %53 = vector.broadcast %31 : vector<1x32xf32> to vector<2x32xf32>
    %54 = arith.addf %52, %53 : vector<2x32xf32>
    %55 = arith.mulf %42, %54 : vector<2x32xf32>
    %56 = arith.addf %51, %55 : vector<2x32xf32>
    %57 = math.tanh %56 : vector<2x32xf32>
    %cst_22 = arith.constant 1.000000e+00 : f32
    %58 = vector.broadcast %cst_22 : f32 to vector<2x32xf32>
    %59 = arith.subf %58, %50 : vector<2x32xf32>
    %60 = arith.mulf %59, %57 : vector<2x32xf32>
    %61 = arith.mulf %50, %32 : vector<2x32xf32>
    %62 = arith.addf %60, %61 : vector<2x32xf32>
    %63 = arith.truncf %62 : vector<2x32xf32> to vector<2x32xbf16>
    %cst_23 = arith.constant dense<0.000000e+00> : vector<2x96xf32>
    %64 = tpu.matmul %63, %16, %cst_23 {dimension_numbers = #tpu.dot_dimension_numbers<[1], [0], [0], [1], [0, 0, 1, 1], [], []>} : vector<2x32xbf16>, vector<32x96xbf16>, vector<2x96xf32> -> vector<2x96xf32>
    %65 = vector.extract_strided_slice %25 {offsets = [2, 0], sizes = [2, 32], strides = [1, 1]} : vector<16x32xf32> to vector<2x32xf32>
    %66 = vector.extract_strided_slice %64 {offsets = [0, 0], sizes = [2, 32], strides = [1, 1]} : vector<2x96xf32> to vector<2x32xf32>
    %67 = arith.addf %65, %66 : vector<2x32xf32>
    %68 = arith.negf %67 : vector<2x32xf32>
    %69 = math.exp %68 : vector<2x32xf32>
    %cst_24 = arith.constant 1.000000e+00 : f32
    %70 = vector.broadcast %cst_24 : f32 to vector<2x32xf32>
    %71 = arith.addf %70, %69 : vector<2x32xf32>
    %72 = arith.divf %70, %71 : vector<2x32xf32>
    %73 = vector.extract_strided_slice %29 {offsets = [2, 0], sizes = [2, 32], strides = [1, 1]} : vector<16x32xf32> to vector<2x32xf32>
    %74 = vector.extract_strided_slice %64 {offsets = [0, 32], sizes = [2, 32], strides = [1, 1]} : vector<2x96xf32> to vector<2x32xf32>
    %75 = arith.addf %73, %74 : vector<2x32xf32>
    %76 = arith.negf %75 : vector<2x32xf32>
    %77 = math.exp %76 : vector<2x32xf32>
    %cst_25 = arith.constant 1.000000e+00 : f32
    %78 = vector.broadcast %cst_25 : f32 to vector<2x32xf32>
    %79 = arith.addf %78, %77 : vector<2x32xf32>
    %80 = arith.divf %78, %79 : vector<2x32xf32>
    %81 = vector.extract_strided_slice %30 {offsets = [2, 0], sizes = [2, 32], strides = [1, 1]} : vector<16x32xf32> to vector<2x32xf32>
    %82 = vector.extract_strided_slice %64 {offsets = [0, 64], sizes = [2, 32], strides = [1, 1]} : vector<2x96xf32> to vector<2x32xf32>
    %83 = vector.broadcast %31 : vector<1x32xf32> to vector<2x32xf32>
    %84 = arith.addf %82, %83 : vector<2x32xf32>
    %85 = arith.mulf %72, %84 : vector<2x32xf32>
    %86 = arith.addf %81, %85 : vector<2x32xf32>
    %87 = math.tanh %86 : vector<2x32xf32>
    %cst_26 = arith.constant 1.000000e+00 : f32
    %88 = vector.broadcast %cst_26 : f32 to vector<2x32xf32>
    %89 = arith.subf %88, %80 : vector<2x32xf32>
    %90 = arith.mulf %89, %87 : vector<2x32xf32>
    %91 = arith.mulf %80, %62 : vector<2x32xf32>
    %92 = arith.addf %90, %91 : vector<2x32xf32>
    %93 = arith.truncf %92 : vector<2x32xf32> to vector<2x32xbf16>
    %cst_27 = arith.constant dense<0.000000e+00> : vector<2x96xf32>
    %94 = tpu.matmul %93, %16, %cst_27 {dimension_numbers = #tpu.dot_dimension_numbers<[1], [0], [0], [1], [0, 0, 1, 1], [], []>} : vector<2x32xbf16>, vector<32x96xbf16>, vector<2x96xf32> -> vector<2x96xf32>
    %95 = vector.extract_strided_slice %25 {offsets = [4, 0], sizes = [2, 32], strides = [1, 1]} : vector<16x32xf32> to vector<2x32xf32>
    %96 = vector.extract_strided_slice %94 {offsets = [0, 0], sizes = [2, 32], strides = [1, 1]} : vector<2x96xf32> to vector<2x32xf32>
    %97 = arith.addf %95, %96 : vector<2x32xf32>
    %98 = arith.negf %97 : vector<2x32xf32>
    %99 = math.exp %98 : vector<2x32xf32>
    %cst_28 = arith.constant 1.000000e+00 : f32
    %100 = vector.broadcast %cst_28 : f32 to vector<2x32xf32>
    %101 = arith.addf %100, %99 : vector<2x32xf32>
    %102 = arith.divf %100, %101 : vector<2x32xf32>
    %103 = vector.extract_strided_slice %29 {offsets = [4, 0], sizes = [2, 32], strides = [1, 1]} : vector<16x32xf32> to vector<2x32xf32>
    %104 = vector.extract_strided_slice %94 {offsets = [0, 32], sizes = [2, 32], strides = [1, 1]} : vector<2x96xf32> to vector<2x32xf32>
    %105 = arith.addf %103, %104 : vector<2x32xf32>
    %106 = arith.negf %105 : vector<2x32xf32>
    %107 = math.exp %106 : vector<2x32xf32>
    %cst_29 = arith.constant 1.000000e+00 : f32
    %108 = vector.broadcast %cst_29 : f32 to vector<2x32xf32>
    %109 = arith.addf %108, %107 : vector<2x32xf32>
    %110 = arith.divf %108, %109 : vector<2x32xf32>
    %111 = vector.extract_strided_slice %30 {offsets = [4, 0], sizes = [2, 32], strides = [1, 1]} : vector<16x32xf32> to vector<2x32xf32>
    %112 = vector.extract_strided_slice %94 {offsets = [0, 64], sizes = [2, 32], strides = [1, 1]} : vector<2x96xf32> to vector<2x32xf32>
    %113 = vector.broadcast %31 : vector<1x32xf32> to vector<2x32xf32>
    %114 = arith.addf %112, %113 : vector<2x32xf32>
    %115 = arith.mulf %102, %114 : vector<2x32xf32>
    %116 = arith.addf %111, %115 : vector<2x32xf32>
    %117 = math.tanh %116 : vector<2x32xf32>
    %cst_30 = arith.constant 1.000000e+00 : f32
    %118 = vector.broadcast %cst_30 : f32 to vector<2x32xf32>
    %119 = arith.subf %118, %110 : vector<2x32xf32>
    %120 = arith.mulf %119, %117 : vector<2x32xf32>
    %121 = arith.mulf %110, %92 : vector<2x32xf32>
    %122 = arith.addf %120, %121 : vector<2x32xf32>
    %123 = arith.truncf %122 : vector<2x32xf32> to vector<2x32xbf16>
    %cst_31 = arith.constant dense<0.000000e+00> : vector<2x96xf32>
    %124 = tpu.matmul %123, %16, %cst_31 {dimension_numbers = #tpu.dot_dimension_numbers<[1], [0], [0], [1], [0, 0, 1, 1], [], []>} : vector<2x32xbf16>, vector<32x96xbf16>, vector<2x96xf32> -> vector<2x96xf32>
    %125 = vector.extract_strided_slice %25 {offsets = [6, 0], sizes = [2, 32], strides = [1, 1]} : vector<16x32xf32> to vector<2x32xf32>
    %126 = vector.extract_strided_slice %124 {offsets = [0, 0], sizes = [2, 32], strides = [1, 1]} : vector<2x96xf32> to vector<2x32xf32>
    %127 = arith.addf %125, %126 : vector<2x32xf32>
    %128 = arith.negf %127 : vector<2x32xf32>
    %129 = math.exp %128 : vector<2x32xf32>
    %cst_32 = arith.constant 1.000000e+00 : f32
    %130 = vector.broadcast %cst_32 : f32 to vector<2x32xf32>
    %131 = arith.addf %130, %129 : vector<2x32xf32>
    %132 = arith.divf %130, %131 : vector<2x32xf32>
    %133 = vector.extract_strided_slice %29 {offsets = [6, 0], sizes = [2, 32], strides = [1, 1]} : vector<16x32xf32> to vector<2x32xf32>
    %134 = vector.extract_strided_slice %124 {offsets = [0, 32], sizes = [2, 32], strides = [1, 1]} : vector<2x96xf32> to vector<2x32xf32>
    %135 = arith.addf %133, %134 : vector<2x32xf32>
    %136 = arith.negf %135 : vector<2x32xf32>
    %137 = math.exp %136 : vector<2x32xf32>
    %cst_33 = arith.constant 1.000000e+00 : f32
    %138 = vector.broadcast %cst_33 : f32 to vector<2x32xf32>
    %139 = arith.addf %138, %137 : vector<2x32xf32>
    %140 = arith.divf %138, %139 : vector<2x32xf32>
    %141 = vector.extract_strided_slice %30 {offsets = [6, 0], sizes = [2, 32], strides = [1, 1]} : vector<16x32xf32> to vector<2x32xf32>
    %142 = vector.extract_strided_slice %124 {offsets = [0, 64], sizes = [2, 32], strides = [1, 1]} : vector<2x96xf32> to vector<2x32xf32>
    %143 = vector.broadcast %31 : vector<1x32xf32> to vector<2x32xf32>
    %144 = arith.addf %142, %143 : vector<2x32xf32>
    %145 = arith.mulf %132, %144 : vector<2x32xf32>
    %146 = arith.addf %141, %145 : vector<2x32xf32>
    %147 = math.tanh %146 : vector<2x32xf32>
    %cst_34 = arith.constant 1.000000e+00 : f32
    %148 = vector.broadcast %cst_34 : f32 to vector<2x32xf32>
    %149 = arith.subf %148, %140 : vector<2x32xf32>
    %150 = arith.mulf %149, %147 : vector<2x32xf32>
    %151 = arith.mulf %140, %122 : vector<2x32xf32>
    %152 = arith.addf %150, %151 : vector<2x32xf32>
    %153 = arith.truncf %152 : vector<2x32xf32> to vector<2x32xbf16>
    %cst_35 = arith.constant dense<0.000000e+00> : vector<2x96xf32>
    %154 = tpu.matmul %153, %16, %cst_35 {dimension_numbers = #tpu.dot_dimension_numbers<[1], [0], [0], [1], [0, 0, 1, 1], [], []>} : vector<2x32xbf16>, vector<32x96xbf16>, vector<2x96xf32> -> vector<2x96xf32>
    %155 = vector.extract_strided_slice %25 {offsets = [8, 0], sizes = [2, 32], strides = [1, 1]} : vector<16x32xf32> to vector<2x32xf32>
    %156 = vector.extract_strided_slice %154 {offsets = [0, 0], sizes = [2, 32], strides = [1, 1]} : vector<2x96xf32> to vector<2x32xf32>
    %157 = arith.addf %155, %156 : vector<2x32xf32>
    %158 = arith.negf %157 : vector<2x32xf32>
    %159 = math.exp %158 : vector<2x32xf32>
    %cst_36 = arith.constant 1.000000e+00 : f32
    %160 = vector.broadcast %cst_36 : f32 to vector<2x32xf32>
    %161 = arith.addf %160, %159 : vector<2x32xf32>
    %162 = arith.divf %160, %161 : vector<2x32xf32>
    %163 = vector.extract_strided_slice %29 {offsets = [8, 0], sizes = [2, 32], strides = [1, 1]} : vector<16x32xf32> to vector<2x32xf32>
    %164 = vector.extract_strided_slice %154 {offsets = [0, 32], sizes = [2, 32], strides = [1, 1]} : vector<2x96xf32> to vector<2x32xf32>
    %165 = arith.addf %163, %164 : vector<2x32xf32>
    %166 = arith.negf %165 : vector<2x32xf32>
    %167 = math.exp %166 : vector<2x32xf32>
    %cst_37 = arith.constant 1.000000e+00 : f32
    %168 = vector.broadcast %cst_37 : f32 to vector<2x32xf32>
    %169 = arith.addf %168, %167 : vector<2x32xf32>
    %170 = arith.divf %168, %169 : vector<2x32xf32>
    %171 = vector.extract_strided_slice %30 {offsets = [8, 0], sizes = [2, 32], strides = [1, 1]} : vector<16x32xf32> to vector<2x32xf32>
    %172 = vector.extract_strided_slice %154 {offsets = [0, 64], sizes = [2, 32], strides = [1, 1]} : vector<2x96xf32> to vector<2x32xf32>
    %173 = vector.broadcast %31 : vector<1x32xf32> to vector<2x32xf32>
    %174 = arith.addf %172, %173 : vector<2x32xf32>
    %175 = arith.mulf %162, %174 : vector<2x32xf32>
    %176 = arith.addf %171, %175 : vector<2x32xf32>
    %177 = math.tanh %176 : vector<2x32xf32>
    %cst_38 = arith.constant 1.000000e+00 : f32
    %178 = vector.broadcast %cst_38 : f32 to vector<2x32xf32>
    %179 = arith.subf %178, %170 : vector<2x32xf32>
    %180 = arith.mulf %179, %177 : vector<2x32xf32>
    %181 = arith.mulf %170, %152 : vector<2x32xf32>
    %182 = arith.addf %180, %181 : vector<2x32xf32>
    %183 = arith.truncf %182 : vector<2x32xf32> to vector<2x32xbf16>
    %cst_39 = arith.constant dense<0.000000e+00> : vector<2x96xf32>
    %184 = tpu.matmul %183, %16, %cst_39 {dimension_numbers = #tpu.dot_dimension_numbers<[1], [0], [0], [1], [0, 0, 1, 1], [], []>} : vector<2x32xbf16>, vector<32x96xbf16>, vector<2x96xf32> -> vector<2x96xf32>
    %185 = vector.extract_strided_slice %25 {offsets = [10, 0], sizes = [2, 32], strides = [1, 1]} : vector<16x32xf32> to vector<2x32xf32>
    %186 = vector.extract_strided_slice %184 {offsets = [0, 0], sizes = [2, 32], strides = [1, 1]} : vector<2x96xf32> to vector<2x32xf32>
    %187 = arith.addf %185, %186 : vector<2x32xf32>
    %188 = arith.negf %187 : vector<2x32xf32>
    %189 = math.exp %188 : vector<2x32xf32>
    %cst_40 = arith.constant 1.000000e+00 : f32
    %190 = vector.broadcast %cst_40 : f32 to vector<2x32xf32>
    %191 = arith.addf %190, %189 : vector<2x32xf32>
    %192 = arith.divf %190, %191 : vector<2x32xf32>
    %193 = vector.extract_strided_slice %29 {offsets = [10, 0], sizes = [2, 32], strides = [1, 1]} : vector<16x32xf32> to vector<2x32xf32>
    %194 = vector.extract_strided_slice %184 {offsets = [0, 32], sizes = [2, 32], strides = [1, 1]} : vector<2x96xf32> to vector<2x32xf32>
    %195 = arith.addf %193, %194 : vector<2x32xf32>
    %196 = arith.negf %195 : vector<2x32xf32>
    %197 = math.exp %196 : vector<2x32xf32>
    %cst_41 = arith.constant 1.000000e+00 : f32
    %198 = vector.broadcast %cst_41 : f32 to vector<2x32xf32>
    %199 = arith.addf %198, %197 : vector<2x32xf32>
    %200 = arith.divf %198, %199 : vector<2x32xf32>
    %201 = vector.extract_strided_slice %30 {offsets = [10, 0], sizes = [2, 32], strides = [1, 1]} : vector<16x32xf32> to vector<2x32xf32>
    %202 = vector.extract_strided_slice %184 {offsets = [0, 64], sizes = [2, 32], strides = [1, 1]} : vector<2x96xf32> to vector<2x32xf32>
    %203 = vector.broadcast %31 : vector<1x32xf32> to vector<2x32xf32>
    %204 = arith.addf %202, %203 : vector<2x32xf32>
    %205 = arith.mulf %192, %204 : vector<2x32xf32>
    %206 = arith.addf %201, %205 : vector<2x32xf32>
    %207 = math.tanh %206 : vector<2x32xf32>
    %cst_42 = arith.constant 1.000000e+00 : f32
    %208 = vector.broadcast %cst_42 : f32 to vector<2x32xf32>
    %209 = arith.subf %208, %200 : vector<2x32xf32>
    %210 = arith.mulf %209, %207 : vector<2x32xf32>
    %211 = arith.mulf %200, %182 : vector<2x32xf32>
    %212 = arith.addf %210, %211 : vector<2x32xf32>
    %213 = arith.truncf %212 : vector<2x32xf32> to vector<2x32xbf16>
    %cst_43 = arith.constant dense<0.000000e+00> : vector<2x96xf32>
    %214 = tpu.matmul %213, %16, %cst_43 {dimension_numbers = #tpu.dot_dimension_numbers<[1], [0], [0], [1], [0, 0, 1, 1], [], []>} : vector<2x32xbf16>, vector<32x96xbf16>, vector<2x96xf32> -> vector<2x96xf32>
    %215 = vector.extract_strided_slice %25 {offsets = [12, 0], sizes = [2, 32], strides = [1, 1]} : vector<16x32xf32> to vector<2x32xf32>
    %216 = vector.extract_strided_slice %214 {offsets = [0, 0], sizes = [2, 32], strides = [1, 1]} : vector<2x96xf32> to vector<2x32xf32>
    %217 = arith.addf %215, %216 : vector<2x32xf32>
    %218 = arith.negf %217 : vector<2x32xf32>
    %219 = math.exp %218 : vector<2x32xf32>
    %cst_44 = arith.constant 1.000000e+00 : f32
    %220 = vector.broadcast %cst_44 : f32 to vector<2x32xf32>
    %221 = arith.addf %220, %219 : vector<2x32xf32>
    %222 = arith.divf %220, %221 : vector<2x32xf32>
    %223 = vector.extract_strided_slice %29 {offsets = [12, 0], sizes = [2, 32], strides = [1, 1]} : vector<16x32xf32> to vector<2x32xf32>
    %224 = vector.extract_strided_slice %214 {offsets = [0, 32], sizes = [2, 32], strides = [1, 1]} : vector<2x96xf32> to vector<2x32xf32>
    %225 = arith.addf %223, %224 : vector<2x32xf32>
    %226 = arith.negf %225 : vector<2x32xf32>
    %227 = math.exp %226 : vector<2x32xf32>
    %cst_45 = arith.constant 1.000000e+00 : f32
    %228 = vector.broadcast %cst_45 : f32 to vector<2x32xf32>
    %229 = arith.addf %228, %227 : vector<2x32xf32>
    %230 = arith.divf %228, %229 : vector<2x32xf32>
    %231 = vector.extract_strided_slice %30 {offsets = [12, 0], sizes = [2, 32], strides = [1, 1]} : vector<16x32xf32> to vector<2x32xf32>
    %232 = vector.extract_strided_slice %214 {offsets = [0, 64], sizes = [2, 32], strides = [1, 1]} : vector<2x96xf32> to vector<2x32xf32>
    %233 = vector.broadcast %31 : vector<1x32xf32> to vector<2x32xf32>
    %234 = arith.addf %232, %233 : vector<2x32xf32>
    %235 = arith.mulf %222, %234 : vector<2x32xf32>
    %236 = arith.addf %231, %235 : vector<2x32xf32>
    %237 = math.tanh %236 : vector<2x32xf32>
    %cst_46 = arith.constant 1.000000e+00 : f32
    %238 = vector.broadcast %cst_46 : f32 to vector<2x32xf32>
    %239 = arith.subf %238, %230 : vector<2x32xf32>
    %240 = arith.mulf %239, %237 : vector<2x32xf32>
    %241 = arith.mulf %230, %212 : vector<2x32xf32>
    %242 = arith.addf %240, %241 : vector<2x32xf32>
    %243 = arith.truncf %242 : vector<2x32xf32> to vector<2x32xbf16>
    %cst_47 = arith.constant dense<0.000000e+00> : vector<2x96xf32>
    %244 = tpu.matmul %243, %16, %cst_47 {dimension_numbers = #tpu.dot_dimension_numbers<[1], [0], [0], [1], [0, 0, 1, 1], [], []>} : vector<2x32xbf16>, vector<32x96xbf16>, vector<2x96xf32> -> vector<2x96xf32>
    %245 = vector.extract_strided_slice %25 {offsets = [14, 0], sizes = [2, 32], strides = [1, 1]} : vector<16x32xf32> to vector<2x32xf32>
    %246 = vector.extract_strided_slice %244 {offsets = [0, 0], sizes = [2, 32], strides = [1, 1]} : vector<2x96xf32> to vector<2x32xf32>
    %247 = arith.addf %245, %246 : vector<2x32xf32>
    %248 = arith.negf %247 : vector<2x32xf32>
    %249 = math.exp %248 : vector<2x32xf32>
    %cst_48 = arith.constant 1.000000e+00 : f32
    %250 = vector.broadcast %cst_48 : f32 to vector<2x32xf32>
    %251 = arith.addf %250, %249 : vector<2x32xf32>
    %252 = arith.divf %250, %251 : vector<2x32xf32>
    %253 = vector.extract_strided_slice %29 {offsets = [14, 0], sizes = [2, 32], strides = [1, 1]} : vector<16x32xf32> to vector<2x32xf32>
    %254 = vector.extract_strided_slice %244 {offsets = [0, 32], sizes = [2, 32], strides = [1, 1]} : vector<2x96xf32> to vector<2x32xf32>
    %255 = arith.addf %253, %254 : vector<2x32xf32>
    %256 = arith.negf %255 : vector<2x32xf32>
    %257 = math.exp %256 : vector<2x32xf32>
    %cst_49 = arith.constant 1.000000e+00 : f32
    %258 = vector.broadcast %cst_49 : f32 to vector<2x32xf32>
    %259 = arith.addf %258, %257 : vector<2x32xf32>
    %260 = arith.divf %258, %259 : vector<2x32xf32>
    %261 = vector.extract_strided_slice %30 {offsets = [14, 0], sizes = [2, 32], strides = [1, 1]} : vector<16x32xf32> to vector<2x32xf32>
    %262 = vector.extract_strided_slice %244 {offsets = [0, 64], sizes = [2, 32], strides = [1, 1]} : vector<2x96xf32> to vector<2x32xf32>
    %263 = vector.broadcast %31 : vector<1x32xf32> to vector<2x32xf32>
    %264 = arith.addf %262, %263 : vector<2x32xf32>
    %265 = arith.mulf %252, %264 : vector<2x32xf32>
    %266 = arith.addf %261, %265 : vector<2x32xf32>
    %267 = math.tanh %266 : vector<2x32xf32>
    %cst_50 = arith.constant 1.000000e+00 : f32
    %268 = vector.broadcast %cst_50 : f32 to vector<2x32xf32>
    %269 = arith.subf %268, %260 : vector<2x32xf32>
    %270 = arith.mulf %269, %267 : vector<2x32xf32>
    %271 = arith.mulf %260, %242 : vector<2x32xf32>
    %272 = arith.addf %270, %271 : vector<2x32xf32>
    %273 = tpu.concatenate %62, %92, %122, %152, %182, %212, %242, %272 in 0 : vector<2x32xf32>, vector<2x32xf32>, vector<2x32xf32>, vector<2x32xf32>, vector<2x32xf32>, vector<2x32xf32>, vector<2x32xf32>, vector<2x32xf32> -> vector<16x32xf32>
    %274 = arith.truncf %273 : vector<16x32xf32> to vector<16x32xbf16>
    %c0_51 = arith.constant 0 : index
    %c0_52 = arith.constant 0 : index
    %c0_53 = arith.constant 0 : index
    %275 = vector.load %arg6[%c0_51, %c0_52, %c0_53] : memref<1x32x96xbf16, #tpu.memory_space<vmem>>, vector<1x32x96xbf16>
    %276 = vector.shape_cast %275 : vector<1x32x96xbf16> to vector<32x96xbf16>
    %c0_54 = arith.constant 0 : index
    %c0_55 = arith.constant 0 : index
    %c0_56 = arith.constant 0 : index
    %277 = vector.load %arg7[%c0_54, %c0_55, %c0_56] : memref<1x1x96xf32, #tpu.memory_space<vmem>>, vector<1x1x96xf32>
    %278 = vector.shape_cast %277 : vector<1x1x96xf32> to vector<1x96xf32>
    %c1 = arith.constant 1 : index
    %c0_57 = arith.constant 0 : index
    %c0_58 = arith.constant 0 : index
    %279 = vector.load %arg8[%c1, %c0_57, %c0_58] : memref<2x32x96xbf16, #tpu.memory_space<vmem>>, vector<1x32x96xbf16>
    %280 = vector.shape_cast %279 : vector<1x32x96xbf16> to vector<32x96xbf16>
    %c1_59 = arith.constant 1 : index
    %c0_60 = arith.constant 0 : index
    %c0_61 = arith.constant 0 : index
    %281 = vector.load %arg9[%c1_59, %c0_60, %c0_61] : memref<2x1x96xf32, #tpu.memory_space<vmem>>, vector<1x1x96xf32>
    %282 = vector.shape_cast %281 : vector<1x1x96xf32> to vector<1x96xf32>
    %cst_62 = arith.constant dense<0.000000e+00> : vector<16x96xf32>
    %283 = tpu.matmul %274, %276, %cst_62 {dimension_numbers = #tpu.dot_dimension_numbers<[1], [0], [0], [1], [0, 0, 1, 1], [], []>} : vector<16x32xbf16>, vector<32x96xbf16>, vector<16x96xf32> -> vector<16x96xf32>
    %284 = vector.broadcast %278 : vector<1x96xf32> to vector<16x96xf32>
    %285 = arith.addf %283, %284 : vector<16x96xf32>
    %286 = vector.extract_strided_slice %285 {offsets = [0, 0], sizes = [16, 32], strides = [1, 1]} : vector<16x96xf32> to vector<16x32xf32>
    %287 = vector.extract_strided_slice %282 {offsets = [0, 0], sizes = [1, 32], strides = [1, 1]} : vector<1x96xf32> to vector<1x32xf32>
    %288 = vector.broadcast %287 : vector<1x32xf32> to vector<16x32xf32>
    %289 = arith.addf %286, %288 : vector<16x32xf32>
    %290 = vector.extract_strided_slice %285 {offsets = [0, 32], sizes = [16, 32], strides = [1, 1]} : vector<16x96xf32> to vector<16x32xf32>
    %291 = vector.extract_strided_slice %282 {offsets = [0, 32], sizes = [1, 32], strides = [1, 1]} : vector<1x96xf32> to vector<1x32xf32>
    %292 = vector.broadcast %291 : vector<1x32xf32> to vector<16x32xf32>
    %293 = arith.addf %290, %292 : vector<16x32xf32>
    %294 = vector.extract_strided_slice %285 {offsets = [0, 64], sizes = [16, 32], strides = [1, 1]} : vector<16x96xf32> to vector<16x32xf32>
    %295 = vector.extract_strided_slice %282 {offsets = [0, 64], sizes = [1, 32], strides = [1, 1]} : vector<1x96xf32> to vector<1x32xf32>
    %cst_63 = arith.constant 0.000000e+00 : f32
    %296 = vector.broadcast %cst_63 : f32 to vector<2x32xf32>
    %297 = arith.truncf %296 : vector<2x32xf32> to vector<2x32xbf16>
    %cst_64 = arith.constant dense<0.000000e+00> : vector<2x96xf32>
    %298 = tpu.matmul %297, %280, %cst_64 {dimension_numbers = #tpu.dot_dimension_numbers<[1], [0], [0], [1], [0, 0, 1, 1], [], []>} : vector<2x32xbf16>, vector<32x96xbf16>, vector<2x96xf32> -> vector<2x96xf32>
    %299 = vector.extract_strided_slice %289 {offsets = [0, 0], sizes = [2, 32], strides = [1, 1]} : vector<16x32xf32> to vector<2x32xf32>
    %300 = vector.extract_strided_slice %298 {offsets = [0, 0], sizes = [2, 32], strides = [1, 1]} : vector<2x96xf32> to vector<2x32xf32>
    %301 = arith.addf %299, %300 : vector<2x32xf32>
    %302 = arith.negf %301 : vector<2x32xf32>
    %303 = math.exp %302 : vector<2x32xf32>
    %cst_65 = arith.constant 1.000000e+00 : f32
    %304 = vector.broadcast %cst_65 : f32 to vector<2x32xf32>
    %305 = arith.addf %304, %303 : vector<2x32xf32>
    %306 = arith.divf %304, %305 : vector<2x32xf32>
    %307 = vector.extract_strided_slice %293 {offsets = [0, 0], sizes = [2, 32], strides = [1, 1]} : vector<16x32xf32> to vector<2x32xf32>
    %308 = vector.extract_strided_slice %298 {offsets = [0, 32], sizes = [2, 32], strides = [1, 1]} : vector<2x96xf32> to vector<2x32xf32>
    %309 = arith.addf %307, %308 : vector<2x32xf32>
    %310 = arith.negf %309 : vector<2x32xf32>
    %311 = math.exp %310 : vector<2x32xf32>
    %cst_66 = arith.constant 1.000000e+00 : f32
    %312 = vector.broadcast %cst_66 : f32 to vector<2x32xf32>
    %313 = arith.addf %312, %311 : vector<2x32xf32>
    %314 = arith.divf %312, %313 : vector<2x32xf32>
    %315 = vector.extract_strided_slice %294 {offsets = [0, 0], sizes = [2, 32], strides = [1, 1]} : vector<16x32xf32> to vector<2x32xf32>
    %316 = vector.extract_strided_slice %298 {offsets = [0, 64], sizes = [2, 32], strides = [1, 1]} : vector<2x96xf32> to vector<2x32xf32>
    %317 = vector.broadcast %295 : vector<1x32xf32> to vector<2x32xf32>
    %318 = arith.addf %316, %317 : vector<2x32xf32>
    %319 = arith.mulf %306, %318 : vector<2x32xf32>
    %320 = arith.addf %315, %319 : vector<2x32xf32>
    %321 = math.tanh %320 : vector<2x32xf32>
    %cst_67 = arith.constant 1.000000e+00 : f32
    %322 = vector.broadcast %cst_67 : f32 to vector<2x32xf32>
    %323 = arith.subf %322, %314 : vector<2x32xf32>
    %324 = arith.mulf %323, %321 : vector<2x32xf32>
    %325 = arith.mulf %314, %296 : vector<2x32xf32>
    %326 = arith.addf %324, %325 : vector<2x32xf32>
    %327 = arith.truncf %326 : vector<2x32xf32> to vector<2x32xbf16>
    %cst_68 = arith.constant dense<0.000000e+00> : vector<2x96xf32>
    %328 = tpu.matmul %327, %280, %cst_68 {dimension_numbers = #tpu.dot_dimension_numbers<[1], [0], [0], [1], [0, 0, 1, 1], [], []>} : vector<2x32xbf16>, vector<32x96xbf16>, vector<2x96xf32> -> vector<2x96xf32>
    %329 = vector.extract_strided_slice %289 {offsets = [2, 0], sizes = [2, 32], strides = [1, 1]} : vector<16x32xf32> to vector<2x32xf32>
    %330 = vector.extract_strided_slice %328 {offsets = [0, 0], sizes = [2, 32], strides = [1, 1]} : vector<2x96xf32> to vector<2x32xf32>
    %331 = arith.addf %329, %330 : vector<2x32xf32>
    %332 = arith.negf %331 : vector<2x32xf32>
    %333 = math.exp %332 : vector<2x32xf32>
    %cst_69 = arith.constant 1.000000e+00 : f32
    %334 = vector.broadcast %cst_69 : f32 to vector<2x32xf32>
    %335 = arith.addf %334, %333 : vector<2x32xf32>
    %336 = arith.divf %334, %335 : vector<2x32xf32>
    %337 = vector.extract_strided_slice %293 {offsets = [2, 0], sizes = [2, 32], strides = [1, 1]} : vector<16x32xf32> to vector<2x32xf32>
    %338 = vector.extract_strided_slice %328 {offsets = [0, 32], sizes = [2, 32], strides = [1, 1]} : vector<2x96xf32> to vector<2x32xf32>
    %339 = arith.addf %337, %338 : vector<2x32xf32>
    %340 = arith.negf %339 : vector<2x32xf32>
    %341 = math.exp %340 : vector<2x32xf32>
    %cst_70 = arith.constant 1.000000e+00 : f32
    %342 = vector.broadcast %cst_70 : f32 to vector<2x32xf32>
    %343 = arith.addf %342, %341 : vector<2x32xf32>
    %344 = arith.divf %342, %343 : vector<2x32xf32>
    %345 = vector.extract_strided_slice %294 {offsets = [2, 0], sizes = [2, 32], strides = [1, 1]} : vector<16x32xf32> to vector<2x32xf32>
    %346 = vector.extract_strided_slice %328 {offsets = [0, 64], sizes = [2, 32], strides = [1, 1]} : vector<2x96xf32> to vector<2x32xf32>
    %347 = vector.broadcast %295 : vector<1x32xf32> to vector<2x32xf32>
    %348 = arith.addf %346, %347 : vector<2x32xf32>
    %349 = arith.mulf %336, %348 : vector<2x32xf32>
    %350 = arith.addf %345, %349 : vector<2x32xf32>
    %351 = math.tanh %350 : vector<2x32xf32>
    %cst_71 = arith.constant 1.000000e+00 : f32
    %352 = vector.broadcast %cst_71 : f32 to vector<2x32xf32>
    %353 = arith.subf %352, %344 : vector<2x32xf32>
    %354 = arith.mulf %353, %351 : vector<2x32xf32>
    %355 = arith.mulf %344, %326 : vector<2x32xf32>
    %356 = arith.addf %354, %355 : vector<2x32xf32>
    %357 = arith.truncf %356 : vector<2x32xf32> to vector<2x32xbf16>
    %cst_72 = arith.constant dense<0.000000e+00> : vector<2x96xf32>
    %358 = tpu.matmul %357, %280, %cst_72 {dimension_numbers = #tpu.dot_dimension_numbers<[1], [0], [0], [1], [0, 0, 1, 1], [], []>} : vector<2x32xbf16>, vector<32x96xbf16>, vector<2x96xf32> -> vector<2x96xf32>
    %359 = vector.extract_strided_slice %289 {offsets = [4, 0], sizes = [2, 32], strides = [1, 1]} : vector<16x32xf32> to vector<2x32xf32>
    %360 = vector.extract_strided_slice %358 {offsets = [0, 0], sizes = [2, 32], strides = [1, 1]} : vector<2x96xf32> to vector<2x32xf32>
    %361 = arith.addf %359, %360 : vector<2x32xf32>
    %362 = arith.negf %361 : vector<2x32xf32>
    %363 = math.exp %362 : vector<2x32xf32>
    %cst_73 = arith.constant 1.000000e+00 : f32
    %364 = vector.broadcast %cst_73 : f32 to vector<2x32xf32>
    %365 = arith.addf %364, %363 : vector<2x32xf32>
    %366 = arith.divf %364, %365 : vector<2x32xf32>
    %367 = vector.extract_strided_slice %293 {offsets = [4, 0], sizes = [2, 32], strides = [1, 1]} : vector<16x32xf32> to vector<2x32xf32>
    %368 = vector.extract_strided_slice %358 {offsets = [0, 32], sizes = [2, 32], strides = [1, 1]} : vector<2x96xf32> to vector<2x32xf32>
    %369 = arith.addf %367, %368 : vector<2x32xf32>
    %370 = arith.negf %369 : vector<2x32xf32>
    %371 = math.exp %370 : vector<2x32xf32>
    %cst_74 = arith.constant 1.000000e+00 : f32
    %372 = vector.broadcast %cst_74 : f32 to vector<2x32xf32>
    %373 = arith.addf %372, %371 : vector<2x32xf32>
    %374 = arith.divf %372, %373 : vector<2x32xf32>
    %375 = vector.extract_strided_slice %294 {offsets = [4, 0], sizes = [2, 32], strides = [1, 1]} : vector<16x32xf32> to vector<2x32xf32>
    %376 = vector.extract_strided_slice %358 {offsets = [0, 64], sizes = [2, 32], strides = [1, 1]} : vector<2x96xf32> to vector<2x32xf32>
    %377 = vector.broadcast %295 : vector<1x32xf32> to vector<2x32xf32>
    %378 = arith.addf %376, %377 : vector<2x32xf32>
    %379 = arith.mulf %366, %378 : vector<2x32xf32>
    %380 = arith.addf %375, %379 : vector<2x32xf32>
    %381 = math.tanh %380 : vector<2x32xf32>
    %cst_75 = arith.constant 1.000000e+00 : f32
    %382 = vector.broadcast %cst_75 : f32 to vector<2x32xf32>
    %383 = arith.subf %382, %374 : vector<2x32xf32>
    %384 = arith.mulf %383, %381 : vector<2x32xf32>
    %385 = arith.mulf %374, %356 : vector<2x32xf32>
    %386 = arith.addf %384, %385 : vector<2x32xf32>
    %387 = arith.truncf %386 : vector<2x32xf32> to vector<2x32xbf16>
    %cst_76 = arith.constant dense<0.000000e+00> : vector<2x96xf32>
    %388 = tpu.matmul %387, %280, %cst_76 {dimension_numbers = #tpu.dot_dimension_numbers<[1], [0], [0], [1], [0, 0, 1, 1], [], []>} : vector<2x32xbf16>, vector<32x96xbf16>, vector<2x96xf32> -> vector<2x96xf32>
    %389 = vector.extract_strided_slice %289 {offsets = [6, 0], sizes = [2, 32], strides = [1, 1]} : vector<16x32xf32> to vector<2x32xf32>
    %390 = vector.extract_strided_slice %388 {offsets = [0, 0], sizes = [2, 32], strides = [1, 1]} : vector<2x96xf32> to vector<2x32xf32>
    %391 = arith.addf %389, %390 : vector<2x32xf32>
    %392 = arith.negf %391 : vector<2x32xf32>
    %393 = math.exp %392 : vector<2x32xf32>
    %cst_77 = arith.constant 1.000000e+00 : f32
    %394 = vector.broadcast %cst_77 : f32 to vector<2x32xf32>
    %395 = arith.addf %394, %393 : vector<2x32xf32>
    %396 = arith.divf %394, %395 : vector<2x32xf32>
    %397 = vector.extract_strided_slice %293 {offsets = [6, 0], sizes = [2, 32], strides = [1, 1]} : vector<16x32xf32> to vector<2x32xf32>
    %398 = vector.extract_strided_slice %388 {offsets = [0, 32], sizes = [2, 32], strides = [1, 1]} : vector<2x96xf32> to vector<2x32xf32>
    %399 = arith.addf %397, %398 : vector<2x32xf32>
    %400 = arith.negf %399 : vector<2x32xf32>
    %401 = math.exp %400 : vector<2x32xf32>
    %cst_78 = arith.constant 1.000000e+00 : f32
    %402 = vector.broadcast %cst_78 : f32 to vector<2x32xf32>
    %403 = arith.addf %402, %401 : vector<2x32xf32>
    %404 = arith.divf %402, %403 : vector<2x32xf32>
    %405 = vector.extract_strided_slice %294 {offsets = [6, 0], sizes = [2, 32], strides = [1, 1]} : vector<16x32xf32> to vector<2x32xf32>
    %406 = vector.extract_strided_slice %388 {offsets = [0, 64], sizes = [2, 32], strides = [1, 1]} : vector<2x96xf32> to vector<2x32xf32>
    %407 = vector.broadcast %295 : vector<1x32xf32> to vector<2x32xf32>
    %408 = arith.addf %406, %407 : vector<2x32xf32>
    %409 = arith.mulf %396, %408 : vector<2x32xf32>
    %410 = arith.addf %405, %409 : vector<2x32xf32>
    %411 = math.tanh %410 : vector<2x32xf32>
    %cst_79 = arith.constant 1.000000e+00 : f32
    %412 = vector.broadcast %cst_79 : f32 to vector<2x32xf32>
    %413 = arith.subf %412, %404 : vector<2x32xf32>
    %414 = arith.mulf %413, %411 : vector<2x32xf32>
    %415 = arith.mulf %404, %386 : vector<2x32xf32>
    %416 = arith.addf %414, %415 : vector<2x32xf32>
    %417 = arith.truncf %416 : vector<2x32xf32> to vector<2x32xbf16>
    %cst_80 = arith.constant dense<0.000000e+00> : vector<2x96xf32>
    %418 = tpu.matmul %417, %280, %cst_80 {dimension_numbers = #tpu.dot_dimension_numbers<[1], [0], [0], [1], [0, 0, 1, 1], [], []>} : vector<2x32xbf16>, vector<32x96xbf16>, vector<2x96xf32> -> vector<2x96xf32>
    %419 = vector.extract_strided_slice %289 {offsets = [8, 0], sizes = [2, 32], strides = [1, 1]} : vector<16x32xf32> to vector<2x32xf32>
    %420 = vector.extract_strided_slice %418 {offsets = [0, 0], sizes = [2, 32], strides = [1, 1]} : vector<2x96xf32> to vector<2x32xf32>
    %421 = arith.addf %419, %420 : vector<2x32xf32>
    %422 = arith.negf %421 : vector<2x32xf32>
    %423 = math.exp %422 : vector<2x32xf32>
    %cst_81 = arith.constant 1.000000e+00 : f32
    %424 = vector.broadcast %cst_81 : f32 to vector<2x32xf32>
    %425 = arith.addf %424, %423 : vector<2x32xf32>
    %426 = arith.divf %424, %425 : vector<2x32xf32>
    %427 = vector.extract_strided_slice %293 {offsets = [8, 0], sizes = [2, 32], strides = [1, 1]} : vector<16x32xf32> to vector<2x32xf32>
    %428 = vector.extract_strided_slice %418 {offsets = [0, 32], sizes = [2, 32], strides = [1, 1]} : vector<2x96xf32> to vector<2x32xf32>
    %429 = arith.addf %427, %428 : vector<2x32xf32>
    %430 = arith.negf %429 : vector<2x32xf32>
    %431 = math.exp %430 : vector<2x32xf32>
    %cst_82 = arith.constant 1.000000e+00 : f32
    %432 = vector.broadcast %cst_82 : f32 to vector<2x32xf32>
    %433 = arith.addf %432, %431 : vector<2x32xf32>
    %434 = arith.divf %432, %433 : vector<2x32xf32>
    %435 = vector.extract_strided_slice %294 {offsets = [8, 0], sizes = [2, 32], strides = [1, 1]} : vector<16x32xf32> to vector<2x32xf32>
    %436 = vector.extract_strided_slice %418 {offsets = [0, 64], sizes = [2, 32], strides = [1, 1]} : vector<2x96xf32> to vector<2x32xf32>
    %437 = vector.broadcast %295 : vector<1x32xf32> to vector<2x32xf32>
    %438 = arith.addf %436, %437 : vector<2x32xf32>
    %439 = arith.mulf %426, %438 : vector<2x32xf32>
    %440 = arith.addf %435, %439 : vector<2x32xf32>
    %441 = math.tanh %440 : vector<2x32xf32>
    %cst_83 = arith.constant 1.000000e+00 : f32
    %442 = vector.broadcast %cst_83 : f32 to vector<2x32xf32>
    %443 = arith.subf %442, %434 : vector<2x32xf32>
    %444 = arith.mulf %443, %441 : vector<2x32xf32>
    %445 = arith.mulf %434, %416 : vector<2x32xf32>
    %446 = arith.addf %444, %445 : vector<2x32xf32>
    %447 = arith.truncf %446 : vector<2x32xf32> to vector<2x32xbf16>
    %cst_84 = arith.constant dense<0.000000e+00> : vector<2x96xf32>
    %448 = tpu.matmul %447, %280, %cst_84 {dimension_numbers = #tpu.dot_dimension_numbers<[1], [0], [0], [1], [0, 0, 1, 1], [], []>} : vector<2x32xbf16>, vector<32x96xbf16>, vector<2x96xf32> -> vector<2x96xf32>
    %449 = vector.extract_strided_slice %289 {offsets = [10, 0], sizes = [2, 32], strides = [1, 1]} : vector<16x32xf32> to vector<2x32xf32>
    %450 = vector.extract_strided_slice %448 {offsets = [0, 0], sizes = [2, 32], strides = [1, 1]} : vector<2x96xf32> to vector<2x32xf32>
    %451 = arith.addf %449, %450 : vector<2x32xf32>
    %452 = arith.negf %451 : vector<2x32xf32>
    %453 = math.exp %452 : vector<2x32xf32>
    %cst_85 = arith.constant 1.000000e+00 : f32
    %454 = vector.broadcast %cst_85 : f32 to vector<2x32xf32>
    %455 = arith.addf %454, %453 : vector<2x32xf32>
    %456 = arith.divf %454, %455 : vector<2x32xf32>
    %457 = vector.extract_strided_slice %293 {offsets = [10, 0], sizes = [2, 32], strides = [1, 1]} : vector<16x32xf32> to vector<2x32xf32>
    %458 = vector.extract_strided_slice %448 {offsets = [0, 32], sizes = [2, 32], strides = [1, 1]} : vector<2x96xf32> to vector<2x32xf32>
    %459 = arith.addf %457, %458 : vector<2x32xf32>
    %460 = arith.negf %459 : vector<2x32xf32>
    %461 = math.exp %460 : vector<2x32xf32>
    %cst_86 = arith.constant 1.000000e+00 : f32
    %462 = vector.broadcast %cst_86 : f32 to vector<2x32xf32>
    %463 = arith.addf %462, %461 : vector<2x32xf32>
    %464 = arith.divf %462, %463 : vector<2x32xf32>
    %465 = vector.extract_strided_slice %294 {offsets = [10, 0], sizes = [2, 32], strides = [1, 1]} : vector<16x32xf32> to vector<2x32xf32>
    %466 = vector.extract_strided_slice %448 {offsets = [0, 64], sizes = [2, 32], strides = [1, 1]} : vector<2x96xf32> to vector<2x32xf32>
    %467 = vector.broadcast %295 : vector<1x32xf32> to vector<2x32xf32>
    %468 = arith.addf %466, %467 : vector<2x32xf32>
    %469 = arith.mulf %456, %468 : vector<2x32xf32>
    %470 = arith.addf %465, %469 : vector<2x32xf32>
    %471 = math.tanh %470 : vector<2x32xf32>
    %cst_87 = arith.constant 1.000000e+00 : f32
    %472 = vector.broadcast %cst_87 : f32 to vector<2x32xf32>
    %473 = arith.subf %472, %464 : vector<2x32xf32>
    %474 = arith.mulf %473, %471 : vector<2x32xf32>
    %475 = arith.mulf %464, %446 : vector<2x32xf32>
    %476 = arith.addf %474, %475 : vector<2x32xf32>
    %477 = arith.truncf %476 : vector<2x32xf32> to vector<2x32xbf16>
    %cst_88 = arith.constant dense<0.000000e+00> : vector<2x96xf32>
    %478 = tpu.matmul %477, %280, %cst_88 {dimension_numbers = #tpu.dot_dimension_numbers<[1], [0], [0], [1], [0, 0, 1, 1], [], []>} : vector<2x32xbf16>, vector<32x96xbf16>, vector<2x96xf32> -> vector<2x96xf32>
    %479 = vector.extract_strided_slice %289 {offsets = [12, 0], sizes = [2, 32], strides = [1, 1]} : vector<16x32xf32> to vector<2x32xf32>
    %480 = vector.extract_strided_slice %478 {offsets = [0, 0], sizes = [2, 32], strides = [1, 1]} : vector<2x96xf32> to vector<2x32xf32>
    %481 = arith.addf %479, %480 : vector<2x32xf32>
    %482 = arith.negf %481 : vector<2x32xf32>
    %483 = math.exp %482 : vector<2x32xf32>
    %cst_89 = arith.constant 1.000000e+00 : f32
    %484 = vector.broadcast %cst_89 : f32 to vector<2x32xf32>
    %485 = arith.addf %484, %483 : vector<2x32xf32>
    %486 = arith.divf %484, %485 : vector<2x32xf32>
    %487 = vector.extract_strided_slice %293 {offsets = [12, 0], sizes = [2, 32], strides = [1, 1]} : vector<16x32xf32> to vector<2x32xf32>
    %488 = vector.extract_strided_slice %478 {offsets = [0, 32], sizes = [2, 32], strides = [1, 1]} : vector<2x96xf32> to vector<2x32xf32>
    %489 = arith.addf %487, %488 : vector<2x32xf32>
    %490 = arith.negf %489 : vector<2x32xf32>
    %491 = math.exp %490 : vector<2x32xf32>
    %cst_90 = arith.constant 1.000000e+00 : f32
    %492 = vector.broadcast %cst_90 : f32 to vector<2x32xf32>
    %493 = arith.addf %492, %491 : vector<2x32xf32>
    %494 = arith.divf %492, %493 : vector<2x32xf32>
    %495 = vector.extract_strided_slice %294 {offsets = [12, 0], sizes = [2, 32], strides = [1, 1]} : vector<16x32xf32> to vector<2x32xf32>
    %496 = vector.extract_strided_slice %478 {offsets = [0, 64], sizes = [2, 32], strides = [1, 1]} : vector<2x96xf32> to vector<2x32xf32>
    %497 = vector.broadcast %295 : vector<1x32xf32> to vector<2x32xf32>
    %498 = arith.addf %496, %497 : vector<2x32xf32>
    %499 = arith.mulf %486, %498 : vector<2x32xf32>
    %500 = arith.addf %495, %499 : vector<2x32xf32>
    %501 = math.tanh %500 : vector<2x32xf32>
    %cst_91 = arith.constant 1.000000e+00 : f32
    %502 = vector.broadcast %cst_91 : f32 to vector<2x32xf32>
    %503 = arith.subf %502, %494 : vector<2x32xf32>
    %504 = arith.mulf %503, %501 : vector<2x32xf32>
    %505 = arith.mulf %494, %476 : vector<2x32xf32>
    %506 = arith.addf %504, %505 : vector<2x32xf32>
    %507 = arith.truncf %506 : vector<2x32xf32> to vector<2x32xbf16>
    %cst_92 = arith.constant dense<0.000000e+00> : vector<2x96xf32>
    %508 = tpu.matmul %507, %280, %cst_92 {dimension_numbers = #tpu.dot_dimension_numbers<[1], [0], [0], [1], [0, 0, 1, 1], [], []>} : vector<2x32xbf16>, vector<32x96xbf16>, vector<2x96xf32> -> vector<2x96xf32>
    %509 = vector.extract_strided_slice %289 {offsets = [14, 0], sizes = [2, 32], strides = [1, 1]} : vector<16x32xf32> to vector<2x32xf32>
    %510 = vector.extract_strided_slice %508 {offsets = [0, 0], sizes = [2, 32], strides = [1, 1]} : vector<2x96xf32> to vector<2x32xf32>
    %511 = arith.addf %509, %510 : vector<2x32xf32>
    %512 = arith.negf %511 : vector<2x32xf32>
    %513 = math.exp %512 : vector<2x32xf32>
    %cst_93 = arith.constant 1.000000e+00 : f32
    %514 = vector.broadcast %cst_93 : f32 to vector<2x32xf32>
    %515 = arith.addf %514, %513 : vector<2x32xf32>
    %516 = arith.divf %514, %515 : vector<2x32xf32>
    %517 = vector.extract_strided_slice %293 {offsets = [14, 0], sizes = [2, 32], strides = [1, 1]} : vector<16x32xf32> to vector<2x32xf32>
    %518 = vector.extract_strided_slice %508 {offsets = [0, 32], sizes = [2, 32], strides = [1, 1]} : vector<2x96xf32> to vector<2x32xf32>
    %519 = arith.addf %517, %518 : vector<2x32xf32>
    %520 = arith.negf %519 : vector<2x32xf32>
    %521 = math.exp %520 : vector<2x32xf32>
    %cst_94 = arith.constant 1.000000e+00 : f32
    %522 = vector.broadcast %cst_94 : f32 to vector<2x32xf32>
    %523 = arith.addf %522, %521 : vector<2x32xf32>
    %524 = arith.divf %522, %523 : vector<2x32xf32>
    %525 = vector.extract_strided_slice %294 {offsets = [14, 0], sizes = [2, 32], strides = [1, 1]} : vector<16x32xf32> to vector<2x32xf32>
    %526 = vector.extract_strided_slice %508 {offsets = [0, 64], sizes = [2, 32], strides = [1, 1]} : vector<2x96xf32> to vector<2x32xf32>
    %527 = vector.broadcast %295 : vector<1x32xf32> to vector<2x32xf32>
    %528 = arith.addf %526, %527 : vector<2x32xf32>
    %529 = arith.mulf %516, %528 : vector<2x32xf32>
    %530 = arith.addf %525, %529 : vector<2x32xf32>
    %531 = math.tanh %530 : vector<2x32xf32>
    %cst_95 = arith.constant 1.000000e+00 : f32
    %532 = vector.broadcast %cst_95 : f32 to vector<2x32xf32>
    %533 = arith.subf %532, %524 : vector<2x32xf32>
    %534 = arith.mulf %533, %531 : vector<2x32xf32>
    %535 = arith.mulf %524, %506 : vector<2x32xf32>
    %536 = arith.addf %534, %535 : vector<2x32xf32>
    %537 = tpu.concatenate %326, %356, %386, %416, %446, %476, %506, %536 in 0 : vector<2x32xf32>, vector<2x32xf32>, vector<2x32xf32>, vector<2x32xf32>, vector<2x32xf32>, vector<2x32xf32>, vector<2x32xf32>, vector<2x32xf32> -> vector<16x32xf32>
    %538 = arith.truncf %537 : vector<16x32xf32> to vector<16x32xbf16>
    %c0_96 = arith.constant 0 : index
    %c0_97 = arith.constant 0 : index
    %539 = vector.load %arg10[%c0_96, %c0_97] : memref<32x16xbf16, #tpu.memory_space<vmem>>, vector<32x16xbf16>
    %cst_98 = arith.constant dense<0.000000e+00> : vector<16x16xf32>
    %540 = tpu.matmul %538, %539, %cst_98 {dimension_numbers = #tpu.dot_dimension_numbers<[1], [0], [0], [1], [0, 0, 1, 1], [], []>} : vector<16x32xbf16>, vector<32x16xbf16>, vector<16x16xf32> -> vector<16x16xf32>
    %c0_99 = arith.constant 0 : index
    %c0_100 = arith.constant 0 : index
    %541 = vector.load %arg11[%c0_99, %c0_100] : memref<1x16xf32, #tpu.memory_space<vmem>>, vector<1x16xf32>
    %542 = vector.broadcast %541 : vector<1x16xf32> to vector<16x16xf32>
    %543 = arith.addf %540, %542 : vector<16x16xf32>
    %544 = math.exp %543 : vector<16x16xf32>
    %c0_101 = arith.constant 0 : index
    %c0_102 = arith.constant 0 : index
    %545 = vector.load %arg12[%c0_101, %c0_102] : memref<16x16xf32, #tpu.memory_space<vmem>>, vector<16x16xf32>
    %cst_103 = arith.constant 0.000000e+00 : f32
    %546 = vector.broadcast %cst_103 : f32 to vector<16x16xf32>
    %547 = arith.subf %546, %545 : vector<16x16xf32>
    %548 = math.log1p %547 : vector<16x16xf32>
    %cst_104 = arith.constant 0.000000e+00 : f32
    %549 = vector.broadcast %cst_104 : f32 to vector<16x16xf32>
    %550 = arith.subf %549, %548 : vector<16x16xf32>
    %cst_105 = arith.constant 0.000000e+00 : f32
    %551 = vector.broadcast %cst_105 : f32 to vector<16x16xf32>
    %552 = arith.subf %551, %543 : vector<16x16xf32>
    %553 = math.exp %552 : vector<16x16xf32>
    %554 = arith.mulf %550, %553 : vector<16x16xf32>
    %555 = vector.extract_strided_slice %554 {offsets = [0, 0], sizes = [2, 16], strides = [1, 1]} : vector<16x16xf32> to vector<2x16xf32>
    %556 = vector.extract_strided_slice %554 {offsets = [2, 0], sizes = [2, 16], strides = [1, 1]} : vector<16x16xf32> to vector<2x16xf32>
    %557 = vector.extract_strided_slice %554 {offsets = [4, 0], sizes = [2, 16], strides = [1, 1]} : vector<16x16xf32> to vector<2x16xf32>
    %558 = vector.extract_strided_slice %554 {offsets = [6, 0], sizes = [2, 16], strides = [1, 1]} : vector<16x16xf32> to vector<2x16xf32>
    %559 = vector.extract_strided_slice %554 {offsets = [8, 0], sizes = [2, 16], strides = [1, 1]} : vector<16x16xf32> to vector<2x16xf32>
    %560 = vector.extract_strided_slice %554 {offsets = [10, 0], sizes = [2, 16], strides = [1, 1]} : vector<16x16xf32> to vector<2x16xf32>
    %561 = vector.extract_strided_slice %554 {offsets = [12, 0], sizes = [2, 16], strides = [1, 1]} : vector<16x16xf32> to vector<2x16xf32>
    %562 = vector.extract_strided_slice %554 {offsets = [14, 0], sizes = [2, 16], strides = [1, 1]} : vector<16x16xf32> to vector<2x16xf32>
    %563 = tpu.concatenate %555, %556, %557, %558, %559, %560, %561, %562 in 1 : vector<2x16xf32>, vector<2x16xf32>, vector<2x16xf32>, vector<2x16xf32>, vector<2x16xf32>, vector<2x16xf32>, vector<2x16xf32>, vector<2x16xf32> -> vector<2x128xf32>
    %c0_106 = arith.constant 0 : index
    %c0_107 = arith.constant 0 : index
    %564 = vector.load %arg13[%c0_106, %c0_107] : memref<2x128xf32, #tpu.memory_space<vmem>>, vector<2x128xf32>
    tpu.vector_store %arg13[%c0_106, %c0_107], %563 {strides = array<i32>} : memref<2x128xf32, #tpu.memory_space<vmem>>, vector<2x128xf32>,
    %565 = vector.extract_strided_slice %544 {offsets = [0, 0], sizes = [2, 16], strides = [1, 1]} : vector<16x16xf32> to vector<2x16xf32>
    %566 = vector.extract_strided_slice %544 {offsets = [2, 0], sizes = [2, 16], strides = [1, 1]} : vector<16x16xf32> to vector<2x16xf32>
    %567 = vector.extract_strided_slice %544 {offsets = [4, 0], sizes = [2, 16], strides = [1, 1]} : vector<16x16xf32> to vector<2x16xf32>
    %568 = vector.extract_strided_slice %544 {offsets = [6, 0], sizes = [2, 16], strides = [1, 1]} : vector<16x16xf32> to vector<2x16xf32>
    %569 = vector.extract_strided_slice %544 {offsets = [8, 0], sizes = [2, 16], strides = [1, 1]} : vector<16x16xf32> to vector<2x16xf32>
    %570 = vector.extract_strided_slice %544 {offsets = [10, 0], sizes = [2, 16], strides = [1, 1]} : vector<16x16xf32> to vector<2x16xf32>
    %571 = vector.extract_strided_slice %544 {offsets = [12, 0], sizes = [2, 16], strides = [1, 1]} : vector<16x16xf32> to vector<2x16xf32>
    %572 = vector.extract_strided_slice %544 {offsets = [14, 0], sizes = [2, 16], strides = [1, 1]} : vector<16x16xf32> to vector<2x16xf32>
    %573 = tpu.concatenate %565, %566, %567, %568, %569, %570, %571, %572 in 1 : vector<2x16xf32>, vector<2x16xf32>, vector<2x16xf32>, vector<2x16xf32>, vector<2x16xf32>, vector<2x16xf32>, vector<2x16xf32>, vector<2x16xf32> -> vector<2x128xf32>
    %c0_108 = arith.constant 0 : index
    %c0_109 = arith.constant 0 : index
    %574 = vector.load %arg14[%c0_108, %c0_109] : memref<2x128xf32, #tpu.memory_space<vmem>>, vector<2x128xf32>
    tpu.vector_store %arg14[%c0_108, %c0_109], %573 {strides = array<i32>} : memref<2x128xf32, #tpu.memory_space<vmem>>, vector<2x128xf32>,
    return
  }
  func.func @transform_0(%arg0: i32) -> (i32, i32) {
    %c0_i32 = arith.constant 0 : i32
    %c0_i32_0 = arith.constant 0 : i32
    %c0_i32_1 = arith.constant 0 : i32
    return %c0_i32, %c0_i32_0 : i32, i32
  }
  func.func @transform_1(%arg0: i32) -> (i32, i32) {
    %c0_i32 = arith.constant 0 : i32
    %c0_i32_0 = arith.constant 0 : i32
    %c0_i32_1 = arith.constant 0 : i32
    return %c0_i32, %c0_i32_0 : i32, i32
  }
  func.func @transform_2(%arg0: i32) -> (i32, i32) {
    %c0_i32 = arith.constant 0 : i32
    %c0_i32_0 = arith.constant 0 : i32
    %c0_i32_1 = arith.constant 0 : i32
    return %c0_i32, %c0_i32_0 : i32, i32
  }
  func.func @transform_3(%arg0: i32) -> (i32, i32) {
    %c0_i32 = arith.constant 0 : i32
    %c0_i32_0 = arith.constant 0 : i32
    %c0_i32_1 = arith.constant 0 : i32
    return %c0_i32, %c0_i32_0 : i32, i32
  }
  func.func @transform_4(%arg0: i32) -> (i32, i32) {
    %c0_i32 = arith.constant 0 : i32
    %c0_i32_0 = arith.constant 0 : i32
    %c0_i32_1 = arith.constant 0 : i32
    return %c0_i32, %c0_i32_0 : i32, i32
  }
  func.func @transform_5(%arg0: i32) -> (i32, i32, i32) {
    %c0_i32 = arith.constant 0 : i32
    %c0_i32_0 = arith.constant 0 : i32
    %c0_i32_1 = arith.constant 0 : i32
    %c0_i32_2 = arith.constant 0 : i32
    return %c0_i32, %c0_i32_0, %c0_i32_1 : i32, i32, i32
  }
  func.func @transform_6(%arg0: i32) -> (i32, i32, i32) {
    %c0_i32 = arith.constant 0 : i32
    %c0_i32_0 = arith.constant 0 : i32
    %c0_i32_1 = arith.constant 0 : i32
    %c0_i32_2 = arith.constant 0 : i32
    return %c0_i32, %c0_i32_0, %c0_i32_1 : i32, i32, i32
  }
  func.func @transform_7(%arg0: i32) -> (i32, i32, i32) {
    %c0_i32 = arith.constant 0 : i32
    %c0_i32_0 = arith.constant 0 : i32
    %c0_i32_1 = arith.constant 0 : i32
    %c0_i32_2 = arith.constant 0 : i32
    return %c0_i32, %c0_i32_0, %c0_i32_1 : i32, i32, i32
  }
  func.func @transform_8(%arg0: i32) -> (i32, i32, i32) {
    %c0_i32 = arith.constant 0 : i32
    %c0_i32_0 = arith.constant 0 : i32
    %c0_i32_1 = arith.constant 0 : i32
    %c0_i32_2 = arith.constant 0 : i32
    return %c0_i32, %c0_i32_0, %c0_i32_1 : i32, i32, i32
  }
  func.func @transform_9(%arg0: i32) -> (i32, i32) {
    %c0_i32 = arith.constant 0 : i32
    %c0_i32_0 = arith.constant 0 : i32
    %c0_i32_1 = arith.constant 0 : i32
    return %c0_i32, %c0_i32_0 : i32, i32
  }
  func.func @transform_10(%arg0: i32) -> (i32, i32) {
    %c0_i32 = arith.constant 0 : i32
    %c0_i32_0 = arith.constant 0 : i32
    %c0_i32_1 = arith.constant 0 : i32
    return %c0_i32, %c0_i32_0 : i32, i32
  }
  func.func @transform_11(%arg0: i32) -> (i32, i32) {
    %c0_i32 = arith.constant 0 : i32
    %c0_i32_0 = arith.constant 0 : i32
    %c0_i32_1 = arith.constant 0 : i32
    return %c0_i32, %c0_i32_0 : i32, i32
  }
  func.func @transform_12(%arg0: i32) -> (i32, i32) {
    %c0_i32 = arith.constant 0 : i32
    %c0_i32_0 = arith.constant 0 : i32
    %c0_i32_1 = arith.constant 0 : i32
    return %c0_i32, %c0_i32_0 : i32, i32
  }
  func.func @transform_13(%arg0: i32) -> (i32, i32) {
    %c0_i32 = arith.constant 0 : i32
    %c0_i32_0 = arith.constant 0 : i32
    %c0_i32_1 = arith.constant 0 : i32
    return %c0_i32, %c0_i32_0 : i32, i32
  }
}

</mosaic_0001>

<bundles_post_ra>
// kernel: evae_forward.1
= control target key start
LH: loop header
LB: loop body
LE: loop exit
PB: predicated region body
PF: predicated region fallthrough
CT: control target
= control target key end

     0   :  { %v2189_v0 = vmov 0.0   ;;  %vm2190_vm0 = vmmov 0   ;;  %vm62_vm1 = vcmask 130048   ;;  %v2191_v7 = vmov 0   ;;  %s2196_s23 = smov 48   ;;  %s2198_s24 = smov 112   ;;  %s2677_s1 = inlined_call_operand.vmem [shape: bf16[16,32], index: 1, kind: input, shape index: {}]   ;;  %s2678_s0 = inlined_call_operand.vmem [shape: f32[16,16], index: 0, kind: input, shape index: {}]   ;;  %s2679_s7 = inlined_call_operand.vmem [shape: bf16[2,32,96], index: 7, kind: input, shape index: {}]   ;;  %s2680_s3 = inlined_call_operand.vmem [shape: bf16[32,96], index: 3, kind: input, shape index: {}]   ;;  %s2681_s2 = inlined_call_operand.vmem [shape: f32[1,32], index: 2, kind: input, shape index: {}]   ;;  %s2682_s8 = inlined_call_operand.vmem [shape: f32[2,1,96], index: 8, kind: input, shape index: {}]   ;;  %s2683_s4 = inlined_call_operand.vmem [shape: f32[1,96], index: 4, kind: input, shape index: {}]   ;;  %s2684_s5 = inlined_call_operand.vmem [shape: bf16[1,32,96], index: 5, kind: input, shape index: {}]   ;;  %s2685_s6 = inlined_call_operand.vmem [shape: f32[1,1,96], index: 6, kind: input, shape index: {}]   ;;  %s2686_s9 = inlined_call_operand.vmem [shape: bf16[32,16], index: 9, kind: input, shape index: {}]   ;;  %s2687_s11 = inlined_call_operand.vmem [shape: f32[16,16], index: 11, kind: input, shape index: {}]   ;;  %s2688_s10 = inlined_call_operand.vmem [shape: f32[1,16], index: 10, kind: input, shape index: {}]   ;;  %s2689_s13 = inlined_call_operand.vmem [shape: f32[2,128], index: 13, kind: output, shape index: {1}]   ;;  %s2690_s12 = inlined_call_operand.vmem [shape: f32[2,128], index: 12, kind: output, shape index: {0}]  }
   0x1   :  { %1902 = vmatprep.subr.bf16.mxu0 %v2189_v0  ;;  %v2070_v1 = vld [vmem:[%s2677_s1] sm:$0xff]   ;;  %1904 = vmatprep.mubr.msk.bf16.mxu0 %vm2190_vm0, %v2189_v0  ;;  %v45_v3 = vld [vmem:[%s2678_s0 + $0x8] sm:$0xff]  ;;  %vm142_vm4 = vcmask 261120   ;;  %vm845_vm5 = vcmask 1041408   ;;  %vm847_vm6 = vcmask 1043456   ;;  %vm849_vm7 = vcmask 1045504  }
   0x2   :  { %v44_v2 = vld [vmem:[%s2678_s0] sm:$0xff]  ;;  %1908 = vmatprep.subr.bf16.mxu1 %v2189_v0  ;;  %1912 = vmatprep.mubr.msk.bf16.mxu1 %vm2190_vm0, %v2189_v0  ;;  %v2295_v6 = vld [vmem:[%s2679_s7 + $0x8] sm:$0xff]   ;;  %vm1731_vm10 = vcmask 392192   ;;  %vm1733_vm11 = vcmask 523264   ;;  %vm1735_vm12 = vcmask 654336   ;;  %vm1737_vm13 = vcmask 785408  }
   0x3   :  { %1903 = vmatpush3.bf16.msra.mxu0 %v2070_v1  ;;  %v46_v4 = vpack.c.bf16 %v45_v3, %v44_v2  ;;  %v2287_v5 = vld [vmem:[%s2679_s7] sm:$0xff]   ;;  %v2074_v9 = vld [vmem:[%s2680_s3 + $0x8] sm:$0xff]   ;;  %vm1739_vm14 = vcmask 916480  }
   0x4   :  { %1916 = vmatprep.subr.bf16.mxu0 %v2189_v0  ;;  %v2073_v8 = vld [vmem:[%s2680_s3] sm:$0xff]   ;;  %s2197_s3 = smov 80  }
   0x5   :  { %1909 = vmatpush3.bf16.msra.mxu1 %v2073_v8  ;;  %v1787_v10 = vld [vmem:[%s2681_s2] ss:$0 sm:$0xff]  ;;  %s2192_s2 = smov 64  }
   0x6   :  { %1905 = vmatmul.mubr.msk.bf16.vlgmr.msra.gmra.mrb[0].mxu0 %vm62_vm1, %v46_v4  ;;  %1910 = vmatprep.subr.bf16.mxu1 %v2189_v0  ;;  %v2323_v19 = vld [vmem:[%s2682_s8] ss:$0 sm:$0xff] }
   0x7   :  { %1917 = vmatpush3.bf16.msra.mxu0 %v2287_v5  ;;  %1920 = vmatprep.mubr.msk.bf16.mxu0 %vm2190_vm0, %v2189_v0  ;;  %v1790_v28 = vld [vmem:[%s2683_s4] ss:$0 sm:$0xff]  ;;  %s2193_s4 = smov 96  }
   0x8   :  { %1918 = vmatprep.subr.bf16.mxu0 %v2189_v0 }
   0x9   :  { %1911 = vmatpush3.bf16.msra.mxu1 %v2074_v9 }
   0xa   :  { %1924 = vmatprep.subr.bf16.mxu1 %v2189_v0 }
   0xb   :  { %1919 = vmatpush3.bf16.msra.mxu0 %v2295_v6 }
   0xc   :  { %1932 = vmatprep.subr.bf16.mxu0 %v2189_v0 }
   0xe   :  { %1921 = vmatmul.mubr.bf16.vlgmr.msra.gmra.mrb[4].mxu0 %v2191_v7 }
   0xf   :  { %1933 = vmatpush3.bf16.msra.mxu0 %v2287_v5  ;;  %1936 = vmatprep.mubr.msk.bf16.mxu0 %vm2190_vm0, %v2189_v0 }
  0x10   :  { %1934 = vmatprep.subr.bf16.mxu0 %v2189_v0 }
  0x13   :  { %1935 = vmatpush3.bf16.msra.mxu0 %v2295_v6 }
  0x14   :  { %1948 = vmatprep.subr.bf16.mxu0 %v2189_v0 }
  0xd9   :  { %v100_v11 = vpop.f32.mrb[0].mxu0 }
  0xda   :  { %v101_v12 = vadd.f32 %v1787_v10, %v100_v11  ;;  %v1906_v13 = vpop.f32.mrb[1].mxu0 }
  0xdb   :  { %v103_v14 = vpop.f32.mrb[2].mxu0 }
  0xdc   :  { %v109_v15 = vmul.f32 0.01, %v101_v12  ;;  %v104_v16 = vadd.f32 %v1787_v10, %v103_v14  ;;  %v1907_v17 = vpop.f32.mrb[3].mxu0  ;;  %vm107_vm2 = vcmp.gt.f32.partialorder %v101_v12, 0.0 }
  0xde   :  { %vm108_vm3 = vcmp.gt.f32.partialorder %v104_v16, 0.0  ;;  %v110_v18 = vmul.f32 0.01, %v104_v16  ;;  %v111_v20 = vsel %vm107_vm2, %v101_v12, %v109_v15 }
  0xe0   :  { %v112_v21 = vsel %vm108_vm3, %v104_v16, %v110_v18 }
  0xe1   :  { %v113_v22 = vpack.c.bf16 %v112_v21, %v111_v20  ;;  %v244_v23 = vpop.f32.mrb[4].mxu0 }
  0xe2   :  { %v1922_v24 = vpop.f32.mrb[5].mxu0  ;;  %v257_v25 = vadd.f32 %v2323_v19, %v244_v23 }
  0xe3   :  { %1913 = vmatmul.mubr.msk.bf16.vlgmr.msra.gmra.mrb[0].mxu1 %vm142_vm4, %v113_v22  ;;  %v247_v26 = vpop.f32.mrb[6].mxu0 }
  0xe4   :  { %v1923_v27 = vpop.f32.mrb[7].mxu0  ;;  %259 = vrot.lane.b32.xlu0 %v257_v25, %s2192_s2  ;;  %1925 = vmatpush3.bf16.msra.mxu1 %v2287_v5 }
  0xe5   :  { %1926 = vmatprep.subr.bf16.mxu1 %v2189_v0  ;;  %1928 = vmatprep.mubr.msk.bf16.mxu1 %vm2190_vm0, %v2189_v0 }
  0xe8   :  { %1927 = vmatpush3.bf16.msra.mxu1 %v2295_v6 }
  0xe9   :  { %1940 = vmatprep.subr.bf16.mxu1 %v2189_v0 }
 0x156   :  { %v260_v40 = vpop.permute.xlu0 %259 }
 0x1b6   :  { %v180_v29 = vpop.f32.mrb[0].mxu1 }
 0x1b7   :  { %v2337_v30 = vadd.f32 %v1790_v28, %v180_v29  ;;  %v1914_v31 = vpop.f32.mrb[1].mxu1 }
 0x1b8   :  { %v183_v32 = vpop.f32.mrb[2].mxu1 }
 0x1b9   :  { %v2341_v33 = vadd.f32 %v2323_v19, %v2337_v30  ;;  %v2343_v34 = vadd.f32 %v1790_v28, %v183_v32  ;;  %v1915_v35 = vpop.f32.mrb[3].mxu1 }
 0x1bb   :  { %v250_v36 = vadd.f32 %v244_v23, %v2341_v33 }
 0x1bd   :  { %v1797_v37 = vmul.f32 -1.442695, %v250_v36 }
 0x1bf   :  { %2081 = vpow2.f32 %v1797_v37 }
 0x1c9   :  { %v2082_v38 = vpop.eup %2081 }
 0x1ca   :  { %v254_v39 = vadd.f32 1.0, %v2082_v38 }
 0x1cc   :  { %2083 = vrcp.f32 %v254_v39 }
 0x1d6   :  { %v2084_v41 = vpop.eup %2083 }
 0x1d7   :  { %v262_v42 = vmul.f32 %v2084_v41, %v260_v40  ;;  %v269_v46 = vsub.f32 1.0, %v2084_v41  ;;  %v275_v48 = vmul.f32 0.0, %v2084_v41 }
 0x1d9   :  { %264 = vrot.lane.b32.xlu0 %v262_v42, %s2192_s2 }
 0x24b   :  { %v265_v43 = vpop.permute.xlu0 %264 }
 0x24c   :  { %v267_v44 = vadd.f32 %v265_v43, %v2337_v30 }
 0x24e   :  { %2085 = vtanh.f32 %v267_v44 }
 0x258   :  { %v2086_v45 = vpop.eup %2085 }
 0x259   :  { %271 = vrot.lane.b32.xlu1 %v2086_v45, %s2193_s4 }
 0x2cb   :  { %v272_v47 = vpop.permute.xlu1 %271 }
 0x2cc   :  { %v274_v49 = vmul.f32 %v272_v47, %v269_v46 }
 0x2ce   :  { %v2349_v50 = vadd.f32 %v275_v48, %v274_v49 }
 0x2d0   :  { %v277_v51 = vpack.c.bf16 %v2349_v50, %v2349_v50  ;;  %v354_v11 = vrot.slane %v2349_v50, 6 }
 0x2d2   :  { %279 = vrot.lane.b32.xlu1 %v277_v51, %s2193_s4 }
 0x344   :  { %v280_v52 = vpop.permute.xlu1 %279 }
 0x345   :  { %1929 = vmatmul.mubr.msk.bf16.vlgmr.msra.gmra.mrb[4].mxu1 %vm142_vm4, %v280_v52 }
 0x346   :  { %1941 = vmatpush3.bf16.msra.mxu1 %v2287_v5  ;;  %1944 = vmatprep.mubr.msk.bf16.mxu1 %vm2190_vm0, %v2189_v0 }
 0x347   :  { %1942 = vmatprep.subr.bf16.mxu1 %v2189_v0 }
 0x34a   :  { %1943 = vmatpush3.bf16.msra.mxu1 %v2295_v6 }
 0x34b   :  { %1956 = vmatprep.subr.bf16.mxu1 %v2189_v0 }
 0x418   :  { %v318_v53 = vpop.f32.mrb[4].mxu1 }
 0x419   :  { %v334_v54 = vadd.f32 %v2323_v19, %v318_v53  ;;  %v1930_v55 = vpop.f32.mrb[5].mxu1  ;;  %v325_v59 = vrot.slane %v318_v53, 6 }
 0x41a   :  { %v321_v56 = vpop.f32.mrb[6].mxu1 }
 0x41b   :  { %v336_v57 = vrot.slane %v334_v54, 6  ;;  %v1931_v58 = vpop.f32.mrb[7].mxu1  ;;  %v327_v60 = vadd.f32 %v325_v59, %v2341_v33 }
 0x41d   :  { %337 = vrot.lane.b32.xlu0 %v336_v57, %s2192_s2  ;;  %v1799_v61 = vmul.f32 -1.442695, %v327_v60 }
 0x41f   :  { %2087 = vpow2.f32 %v1799_v61 }
 0x429   :  { %v2088_v62 = vpop.eup %2087 }
 0x42a   :  { %v331_v63 = vadd.f32 1.0, %v2088_v62 }
 0x42c   :  { %2089 = vrcp.f32 %v331_v63 }
 0x436   :  { %v2090_v1 = vpop.eup %2089 }
 0x437   :  { %v347_v10 = vsub.f32 1.0, %v2090_v1  ;;  %v356_v13 = vmul.f32 %v2090_v1, %v354_v11 }
 0x48f   :  { %v338_v2 = vpop.permute.xlu0 %337 }
 0x490   :  { %v340_v3 = vmul.f32 %v2090_v1, %v338_v2 }
 0x492   :  { %342 = vrot.lane.b32.xlu1 %v340_v3, %s2192_s2 }
 0x504   :  { %v343_v4 = vpop.permute.xlu1 %342 }
 0x505   :  { %v345_v8 = vadd.f32 %v343_v4, %v2337_v30 }
 0x507   :  { %2091 = vtanh.f32 %v345_v8 }
 0x511   :  { %v2092_v9 = vpop.eup %2091 }
 0x512   :  { %349 = vrot.lane.b32.xlu0 %v2092_v9, %s2193_s4 }
 0x584   :  { %v350_v12 = vpop.permute.xlu0 %349 }
 0x585   :  { %v352_v14 = vmul.f32 %v350_v12, %v347_v10 }
 0x587   :  { %v357_v15 = vadd.f32 %v356_v13, %v352_v14 }
 0x589   :  { %v358_v16 = vpack.c.bf16 %v357_v15, %v357_v15  ;;  %v436_v41 = vrot.slane %v357_v15, 6  ;;  %v846_v46 = vsel %vm845_vm5, %v2349_v50, %v357_v15 }
 0x58b   :  { %v360_v17 = vrot.slane %v358_v16, 1 }
 0x58d   :  { %361 = vrot.lane.b32.xlu1 %v360_v17, %s2193_s4 }
 0x5ff   :  { %v362_v18 = vpop.permute.xlu1 %361 }
 0x600   :  { %1937 = vmatmul.mubr.msk.bf16.vlgmr.msra.gmra.mrb[8].mxu0 %vm142_vm4, %v362_v18 }
 0x601   :  { %1949 = vmatpush3.bf16.msra.mxu0 %v2287_v5  ;;  %1952 = vmatprep.mubr.msk.bf16.mxu0 %vm2190_vm0, %v2189_v0 }
 0x602   :  { %1950 = vmatprep.subr.bf16.mxu0 %v2189_v0 }
 0x605   :  { %1951 = vmatpush3.bf16.msra.mxu0 %v2295_v6 }
 0x606   :  { %1964 = vmatprep.subr.bf16.mxu0 %v2189_v0 }
 0x6d3   :  { %v400_v20 = vpop.f32.mrb[8].mxu0 }
 0x6d4   :  { %v416_v21 = vadd.f32 %v2323_v19, %v400_v20  ;;  %v1938_v22 = vpop.f32.mrb[9].mxu0  ;;  %v407_v26 = vrot.slane %v400_v20, 4 }
 0x6d5   :  { %v403_v23 = vpop.f32.mrb[10].mxu0  ;;  %v2414_v22 = vadd.f32 %v2323_v19, %v2343_v34 }
 0x6d6   :  { %v418_v24 = vrot.slane %v416_v21, 4  ;;  %v1939_v25 = vpop.f32.mrb[11].mxu0  ;;  %v409_v27 = vadd.f32 %v407_v26, %v2341_v33 }
 0x6d8   :  { %419 = vrot.lane.b32.xlu0 %v418_v24, %s2192_s2  ;;  %v1801_v28 = vmul.f32 -1.442695, %v409_v27 }
 0x6da   :  { %2093 = vpow2.f32 %v1801_v28 }
 0x6e4   :  { %v2094_v29 = vpop.eup %2093 }
 0x6e5   :  { %v413_v31 = vadd.f32 1.0, %v2094_v29 }
 0x6e7   :  { %2095 = vrcp.f32 %v413_v31 }
 0x6f1   :  { %v2096_v32 = vpop.eup %2095 }
 0x6f2   :  { %v429_v40 = vsub.f32 1.0, %v2096_v32  ;;  %v438_v43 = vmul.f32 %v2096_v32, %v436_v41 }
 0x74a   :  { %v420_v35 = vpop.permute.xlu0 %419 }
 0x74b   :  { %v422_v36 = vmul.f32 %v2096_v32, %v420_v35 }
 0x74d   :  { %424 = vrot.lane.b32.xlu1 %v422_v36, %s2192_s2 }
 0x7bf   :  { %v425_v37 = vpop.permute.xlu1 %424 }
 0x7c0   :  { %v427_v38 = vadd.f32 %v425_v37, %v2337_v30 }
 0x7c2   :  { %2097 = vtanh.f32 %v427_v38 }
 0x7cc   :  { %v2098_v39 = vpop.eup %2097 }
 0x7cd   :  { %431 = vrot.lane.b32.xlu0 %v2098_v39, %s2193_s4 }
 0x83f   :  { %v432_v42 = vpop.permute.xlu0 %431 }
 0x840   :  { %v434_v44 = vmul.f32 %v432_v42, %v429_v40 }
 0x842   :  { %v439_v45 = vadd.f32 %v438_v43, %v434_v44 }
 0x844   :  { %v848_v47 = vsel %vm847_vm6, %v846_v46, %v439_v45  ;;  %v440_v48 = vpack.c.bf16 %v439_v45, %v439_v45  ;;  %v518_v9 = vrot.slane %v439_v45, 6 }
 0x846   :  { %v442_v49 = vrot.slane %v440_v48, 2 }
 0x848   :  { %443 = vrot.lane.b32.xlu1 %v442_v49, %s2193_s4 }
 0x8ba   :  { %v444_v51 = vpop.permute.xlu1 %443 }
 0x8bb   :  { %1945 = vmatmul.mubr.msk.bf16.vlgmr.msra.gmra.mrb[8].mxu1 %vm142_vm4, %v444_v51 }
 0x8bc   :  { %1957 = vmatpush3.bf16.msra.mxu1 %v2287_v5  ;;  %1960 = vmatprep.mubr.msk.bf16.mxu1 %vm2190_vm0, %v2189_v0 }
 0x8bd   :  { %1958 = vmatprep.subr.bf16.mxu1 %v2189_v0 }
 0x8c0   :  { %1959 = vmatpush3.bf16.msra.mxu1 %v2295_v6 }
 0x8c1   :  { %1972 = vmatprep.subr.bf16.mxu1 %v2189_v0 }
 0x98e   :  { %v482_v50 = vpop.f32.mrb[8].mxu1 }
 0x98f   :  { %v498_v52 = vadd.f32 %v2323_v19, %v482_v50  ;;  %v1946_v53 = vpop.f32.mrb[9].mxu1  ;;  %v489_v57 = vrot.slane %v482_v50, 2 }
 0x990   :  { %v485_v54 = vpop.f32.mrb[10].mxu1 }
 0x991   :  { %v500_v55 = vrot.slane %v498_v52, 2  ;;  %v1947_v56 = vpop.f32.mrb[11].mxu1  ;;  %v491_v58 = vadd.f32 %v489_v57, %v2341_v33 }
 0x993   :  { %501 = vrot.lane.b32.xlu0 %v500_v55, %s2192_s2  ;;  %v1803_v59 = vmul.f32 -1.442695, %v491_v58 }
 0x995   :  { %2099 = vpow2.f32 %v1803_v59 }
 0x99f   :  { %v2100_v60 = vpop.eup %2099 }
 0x9a0   :  { %v495_v61 = vadd.f32 1.0, %v2100_v60 }
 0x9a2   :  { %2101 = vrcp.f32 %v495_v61 }
 0x9ac   :  { %v2102_v62 = vpop.eup %2101 }
 0x9ad   :  { %v511_v8 = vsub.f32 1.0, %v2102_v62  ;;  %v520_v10 = vmul.f32 %v2102_v62, %v518_v9 }
 0xa05   :  { %v502_v63 = vpop.permute.xlu0 %501 }
 0xa06   :  { %v504_v1 = vmul.f32 %v2102_v62, %v502_v63 }
 0xa08   :  { %506 = vrot.lane.b32.xlu1 %v504_v1, %s2192_s2 }
 0xa7a   :  { %v507_v2 = vpop.permute.xlu1 %506 }
 0xa7b   :  { %v509_v3 = vadd.f32 %v507_v2, %v2337_v30 }
 0xa7d   :  { %2103 = vtanh.f32 %v509_v3 }
 0xa87   :  { %v2104_v4 = vpop.eup %2103 }
 0xa88   :  { %513 = vrot.lane.b32.xlu0 %v2104_v4, %s2193_s4 }
 0xafa   :  { %v514_v33 = vpop.permute.xlu0 %513 }
 0xafb   :  { %v516_v11 = vmul.f32 %v514_v33, %v511_v8 }
 0xafd   :  { %v521_v12 = vadd.f32 %v520_v10, %v516_v11 }
 0xaff   :  { %v522_v13 = vpack.c.bf16 %v521_v12, %v521_v12  ;;  %v2400_v14 = vsel %vm849_vm7, %v848_v47, %v521_v12  ;;  %v596_v37 = vrot.slane %v521_v12, 6 }
 0xb01   :  { %v524_v15 = vrot.slane %v522_v13, 3 }
 0xb03   :  { %525 = vrot.lane.b32.xlu1 %v524_v15, %s2193_s4 }
 0xb75   :  { %v526_v16 = vpop.permute.xlu1 %525 }
 0xb76   :  { %1953 = vmatmul.mubr.msk.bf16.vlgmr.msra.gmra.mrb[12].mxu0 %vm142_vm4, %v526_v16 }
 0xb77   :  { %1965 = vmatpush3.bf16.msra.mxu0 %v2287_v5  ;;  %1968 = vmatprep.mubr.msk.bf16.mxu0 %vm2190_vm0, %v2189_v0 }
 0xb78   :  { %1966 = vmatprep.subr.bf16.mxu0 %v2189_v0 }
 0xb7b   :  { %1967 = vmatpush3.bf16.msra.mxu0 %v2295_v6 }
 0xb7c   :  { %1980 = vmatprep.subr.bf16.mxu0 %v2189_v0 }
 0xc49   :  { %v564_v30 = vpop.f32.mrb[12].mxu0 }
 0xc4a   :  { %v577_v17 = vadd.f32 %v2323_v19, %v564_v30  ;;  %v1954_v18 = vpop.f32.mrb[13].mxu0  ;;  %v570_v23 = vadd.f32 %v564_v30, %v2414_v22 }
 0xc4b   :  { %v567_v20 = vpop.f32.mrb[14].mxu0 }
 0xc4c   :  { %579 = vrot.lane.b32.xlu0 %v577_v17, %s2192_s2  ;;  %v1955_v21 = vpop.f32.mrb[15].mxu0  ;;  %v1805_v24 = vmul.f32 -1.442695, %v570_v23 }
 0xc4e   :  { %2105 = vpow2.f32 %v1805_v24 }
 0xc58   :  { %v2106_v25 = vpop.eup %2105 }
 0xc59   :  { %v574_v26 = vadd.f32 1.0, %v2106_v25 }
 0xc5b   :  { %2107 = vrcp.f32 %v574_v26 }
 0xc65   :  { %v2108_v27 = vpop.eup %2107 }
 0xc66   :  { %v589_v36 = vsub.f32 1.0, %v2108_v27  ;;  %v598_v39 = vmul.f32 %v2108_v27, %v596_v37 }
 0xcbe   :  { %v580_v28 = vpop.permute.xlu0 %579 }
 0xcbf   :  { %v582_v29 = vmul.f32 %v2108_v27, %v580_v28 }
 0xcc1   :  { %584 = vrot.lane.b32.xlu1 %v582_v29, %s2192_s2 }
 0xd33   :  { %v585_v31 = vpop.permute.xlu1 %584 }
 0xd34   :  { %v587_v32 = vadd.f32 %v585_v31, %v2343_v34 }
 0xd36   :  { %2109 = vtanh.f32 %v587_v32 }
 0xd40   :  { %v2110_v35 = vpop.eup %2109 }
 0xd41   :  { %591 = vrot.lane.b32.xlu0 %v2110_v35, %s2193_s4 }
 0xdb3   :  { %v592_v38 = vpop.permute.xlu0 %591 }
 0xdb4   :  { %v594_v40 = vmul.f32 %v592_v38, %v589_v36 }
 0xdb6   :  { %v2420_v41 = vadd.f32 %v598_v39, %v594_v40 }
 0xdb8   :  { %v600_v42 = vpack.c.bf16 %v2420_v41, %v2420_v41  ;;  %v677_v60 = vrot.slane %v2420_v41, 6 }
 0xdba   :  { %602 = vrot.lane.b32.xlu1 %v600_v42, %s2193_s4 }
 0xe2c   :  { %v603_v43 = vpop.permute.xlu1 %602 }
 0xe2d   :  { %1961 = vmatmul.mubr.msk.bf16.vlgmr.msra.gmra.mrb[12].mxu1 %vm142_vm4, %v603_v43 }
 0xe2e   :  { %1973 = vmatpush3.bf16.msra.mxu1 %v2287_v5  ;;  %1976 = vmatprep.mubr.msk.bf16.mxu1 %vm2190_vm0, %v2189_v0 }
 0xe2f   :  { %1974 = vmatprep.subr.bf16.mxu1 %v2189_v0 }
 0xe32   :  { %1975 = vmatpush3.bf16.msra.mxu1 %v2295_v6 }
 0xe33   :  { %1988 = vmatprep.subr.bf16.mxu1 %v2189_v0 }
 0xf00   :  { %v641_v44 = vpop.f32.mrb[12].mxu1 }
 0xf01   :  { %v657_v45 = vadd.f32 %v2323_v19, %v641_v44  ;;  %v1962_v46 = vpop.f32.mrb[13].mxu1  ;;  %v648_v51 = vrot.slane %v641_v44, 6 }
 0xf02   :  { %v644_v47 = vpop.f32.mrb[14].mxu1 }
 0xf03   :  { %v659_v48 = vrot.slane %v657_v45, 6  ;;  %v1963_v49 = vpop.f32.mrb[15].mxu1  ;;  %v650_v5 = vadd.f32 %v648_v51, %v2414_v22 }
 0xf05   :  { %660 = vrot.lane.b32.xlu0 %v659_v48, %s2192_s2  ;;  %v1807_v50 = vmul.f32 -1.442695, %v650_v5 }
 0xf07   :  { %2111 = vpow2.f32 %v1807_v50 }
 0xf11   :  { %v2112_v52 = vpop.eup %2111 }
 0xf12   :  { %v654_v53 = vadd.f32 1.0, %v2112_v52 }
 0xf14   :  { %2113 = vrcp.f32 %v654_v53 }
 0xf1e   :  { %v2114_v6 = vpop.eup %2113 }
 0xf1f   :  { %v670_v59 = vsub.f32 1.0, %v2114_v6  ;;  %v679_v62 = vmul.f32 %v2114_v6, %v677_v60 }
 0xf77   :  { %v661_v54 = vpop.permute.xlu0 %660 }
 0xf78   :  { %v663_v55 = vmul.f32 %v2114_v6, %v661_v54  ;;  %v2464_v6 = vld [vmem:[%s2679_s7 + $0x10] sm:$0xff]   ;;  %v2473_v54 = vld [vmem:[%s2679_s7 + $0x18] sm:$0xff]  }
 0xf7a   :  { %665 = vrot.lane.b32.xlu1 %v663_v55, %s2192_s2 }
 0xfec   :  { %v666_v56 = vpop.permute.xlu1 %665 }
 0xfed   :  { %v668_v57 = vadd.f32 %v666_v56, %v2343_v34 }
 0xfef   :  { %2115 = vtanh.f32 %v668_v57 }
 0xff9   :  { %v2116_v58 = vpop.eup %2115 }
 0xffa   :  { %672 = vrot.lane.b32.xlu0 %v2116_v58, %s2193_s4 }
0x106c   :  { %v673_v61 = vpop.permute.xlu0 %672 }
0x106d   :  { %v675_v63 = vmul.f32 %v673_v61, %v670_v59 }
0x106f   :  { %v680_v1 = vadd.f32 %v679_v62, %v675_v63  ;;  %v2497_v63 = vld [vmem:[%s2682_s8 + $0x1] ss:$0 sm:$0xff] }
0x1071   :  { %v681_v2 = vpack.c.bf16 %v680_v1, %v680_v1  ;;  %v759_v27 = vrot.slane %v680_v1, 6  ;;  %v851_v35 = vsel %vm845_vm5, %v2420_v41, %v680_v1 }
0x1073   :  { %v683_v3 = vrot.slane %v681_v2, 1 }
0x1075   :  { %684 = vrot.lane.b32.xlu1 %v683_v3, %s2193_s4 }
0x10e7   :  { %v685_v4 = vpop.permute.xlu1 %684 }
0x10e8   :  { %1969 = vmatmul.mubr.msk.bf16.vlgmr.msra.gmra.mrb[16].mxu0 %vm142_vm4, %v685_v4 }
0x10e9   :  { %1984 = vmatprep.mubr.msk.bf16.mxu0 %vm2190_vm0, %v2189_v0 }
0x11bb   :  { %v723_v8 = vpop.f32.mrb[16].mxu0 }
0x11bc   :  { %v739_v9 = vadd.f32 %v2323_v19, %v723_v8  ;;  %v1970_v33 = vpop.f32.mrb[17].mxu0  ;;  %v730_v13 = vrot.slane %v723_v8, 4 }
0x11bd   :  { %v726_v10 = vpop.f32.mrb[18].mxu0 }
0x11be   :  { %v741_v11 = vrot.slane %v739_v9, 4  ;;  %v1971_v12 = vpop.f32.mrb[19].mxu0  ;;  %v732_v15 = vadd.f32 %v730_v13, %v2414_v22 }
0x11c0   :  { %742 = vrot.lane.b32.xlu0 %v741_v11, %s2192_s2  ;;  %v1809_v16 = vmul.f32 -1.442695, %v732_v15 }
0x11c2   :  { %2117 = vpow2.f32 %v1809_v16 }
0x11cc   :  { %v2118_v30 = vpop.eup %2117 }
0x11cd   :  { %v736_v17 = vadd.f32 1.0, %v2118_v30 }
0x11cf   :  { %2119 = vrcp.f32 %v736_v17 }
0x11d9   :  { %v2120_v18 = vpop.eup %2119 }
0x11da   :  { %v752_v26 = vsub.f32 1.0, %v2120_v18  ;;  %v761_v29 = vmul.f32 %v2120_v18, %v759_v27 }
0x1232   :  { %v743_v20 = vpop.permute.xlu0 %742 }
0x1233   :  { %v745_v21 = vmul.f32 %v2120_v18, %v743_v20 }
0x1235   :  { %747 = vrot.lane.b32.xlu1 %v745_v21, %s2192_s2 }
0x12a7   :  { %v748_v23 = vpop.permute.xlu1 %747 }
0x12a8   :  { %v750_v24 = vadd.f32 %v748_v23, %v2343_v34 }
0x12aa   :  { %2121 = vtanh.f32 %v750_v24 }
0x12b4   :  { %v2122_v25 = vpop.eup %2121 }
0x12b5   :  { %754 = vrot.lane.b32.xlu0 %v2122_v25, %s2193_s4 }
0x1327   :  { %v755_v28 = vpop.permute.xlu0 %754 }
0x1328   :  { %v757_v31 = vmul.f32 %v755_v28, %v752_v26 }
0x132a   :  { %v762_v32 = vadd.f32 %v761_v29, %v757_v31 }
0x132c   :  { %v852_v36 = vsel %vm847_vm6, %v851_v35, %v762_v32  ;;  %v763_v37 = vpack.c.bf16 %v762_v32, %v762_v32  ;;  %v841_v57 = vrot.slane %v762_v32, 6 }
0x132e   :  { %v765_v38 = vrot.slane %v763_v37, 2 }
0x1330   :  { %766 = vrot.lane.b32.xlu1 %v765_v38, %s2193_s4 }
0x13a2   :  { %v767_v39 = vpop.permute.xlu1 %766 }
0x13a3   :  { %1977 = vmatmul.mubr.msk.bf16.vlgmr.msra.gmra.mrb[16].mxu1 %vm142_vm4, %v767_v39 }
0x13a4   :  { %1992 = vmatprep.mubr.msk.bf16.mxu1 %vm2190_vm0, %v2189_v0  ;;  %1989 = vmatpush3.bf16.msra.mxu1 %v2464_v6 }
0x13a5   :  { %1990 = vmatprep.subr.bf16.mxu1 %v2189_v0 }
0x13a8   :  { %1991 = vmatpush3.bf16.msra.mxu1 %v2473_v54 }
0x13a9   :  { %2004 = vmatprep.subr.bf16.mxu1 %v2189_v0 }
0x13ab   :  { %1993 = vmatmul.mubr.bf16.vlgmr.msra.gmra.mrb[20].mxu1 %v2191_v7 }
0x13ac   :  { %2005 = vmatpush3.bf16.msra.mxu1 %v2464_v6  ;;  %2008 = vmatprep.mubr.msk.bf16.mxu1 %vm2190_vm0, %v2189_v0 }
0x13ad   :  { %2006 = vmatprep.subr.bf16.mxu1 %v2189_v0 }
0x13b0   :  { %2007 = vmatpush3.bf16.msra.mxu1 %v2473_v54 }
0x13b1   :  { %2020 = vmatprep.subr.bf16.mxu1 %v2189_v0 }
0x1476   :  { %v805_v40 = vpop.f32.mrb[16].mxu1 }
0x1477   :  { %v821_v42 = vadd.f32 %v2323_v19, %v805_v40  ;;  %v1978_v43 = vpop.f32.mrb[17].mxu1  ;;  %v812_v41 = vrot.slane %v805_v40, 2 }
0x1478   :  { %v808_v44 = vpop.f32.mrb[18].mxu1 }
0x1479   :  { %v823_v45 = vrot.slane %v821_v42, 2  ;;  %v1979_v46 = vpop.f32.mrb[19].mxu1  ;;  %v814_v47 = vadd.f32 %v812_v41, %v2414_v22  ;;  %v2077_v22 = vld [vmem:[%s2684_s5] sm:$0xff]  }
0x147a   :  { %1981 = vmatpush3.bf16.msra.mxu0 %v2077_v22 }
0x147b   :  { %824 = vrot.lane.b32.xlu0 %v823_v45, %s2192_s2  ;;  %v1811_v48 = vmul.f32 -1.442695, %v814_v47  ;;  %1982 = vmatprep.subr.bf16.mxu0 %v2189_v0 }
0x147d   :  { %2123 = vpow2.f32 %v1811_v48 }
0x147e   :  { %v986_v1 = vpop.f32.mrb[20].mxu1 }
0x147f   :  { %v999_v2 = vadd.f32 %v2497_v63, %v986_v1  ;;  %v1994_v3 = vpop.f32.mrb[21].mxu1 }
0x1480   :  { %v989_v4 = vpop.f32.mrb[22].mxu1 }
0x1481   :  { %v1995_v8 = vpop.f32.mrb[23].mxu1 }
0x1487   :  { %v2124_v49 = vpop.eup %2123 }
0x1488   :  { %v818_v51 = vadd.f32 1.0, %v2124_v49 }
0x148a   :  { %2125 = vrcp.f32 %v818_v51 }
0x1494   :  { %v2126_v5 = vpop.eup %2125 }
0x1495   :  { %v834_v56 = vsub.f32 1.0, %v2126_v5  ;;  %v843_v59 = vmul.f32 %v2126_v5, %v841_v57 }
0x14ed   :  { %v825_v50 = vpop.permute.xlu0 %824 }
0x14ee   :  { %v827_v52 = vmul.f32 %v2126_v5, %v825_v50 }
0x14f0   :  { %829 = vrot.lane.b32.xlu1 %v827_v52, %s2192_s2 }
0x1562   :  { %v830_v19 = vpop.permute.xlu1 %829 }
0x1563   :  { %v832_v53 = vadd.f32 %v830_v19, %v2343_v34  ;;  %v2078_v34 = vld [vmem:[%s2684_s5 + $0x8] sm:$0xff]  }
0x1564   :  { %1983 = vmatpush3.bf16.msra.mxu0 %v2078_v34 }
0x1565   :  { %2127 = vtanh.f32 %v832_v53  ;;  %1996 = vmatprep.subr.bf16.mxu0 %v2189_v0 }
0x156f   :  { %v2128_v55 = vpop.eup %2127 }
0x1570   :  { %836 = vrot.lane.b32.xlu0 %v2128_v55, %s2193_s4 }
0x1574   :  { %1001 = vrot.lane.b32.xlu0 %v999_v2, %s2192_s2 }
0x15e2   :  { %v837_v58 = vpop.permute.xlu0 %836 }
0x15e3   :  { %v839_v60 = vmul.f32 %v837_v58, %v834_v56 }
0x15e5   :  { %v844_v61 = vadd.f32 %v843_v59, %v839_v60 }
0x15e6   :  { %v1002_v21 = vpop.permute.xlu0 %1001 }
0x15e7   :  { %v853_v62 = vsel %vm849_vm7, %v852_v36, %v844_v61 }
0x15e8   :  { %v854_v7 = vpack.c.bf16 %v853_v62, %v2400_v14  ;;  %v1817_v14 = vld [vmem:[%s2685_s6] ss:$0 sm:$0xff] }
0x15ea   :  { %874 = vrot.lane.b32.xlu1 %v854_v7, %s2193_s4 }
0x165c   :  { %v875_v9 = vpop.permute.xlu1 %874 }
0x165d   :  { %1985 = vmatmul.mubr.msk.bf16.vlgmr.msra.gmra.mrb[20].mxu0 %vm142_vm4, %v875_v9 }
0x165e   :  { %1997 = vmatpush3.bf16.msra.mxu0 %v2464_v6  ;;  %2000 = vmatprep.mubr.msk.bf16.mxu0 %vm2190_vm0, %v2189_v0 }
0x165f   :  { %1998 = vmatprep.subr.bf16.mxu0 %v2189_v0 }
0x1662   :  { %1999 = vmatpush3.bf16.msra.mxu0 %v2473_v54 }
0x1663   :  { %2012 = vmatprep.subr.bf16.mxu0 %v2189_v0 }
0x1730   :  { %v925_v33 = vpop.f32.mrb[20].mxu0 }
0x1731   :  { %v2511_v10 = vadd.f32 %v1817_v14, %v925_v33  ;;  %v1986_v11 = vpop.f32.mrb[21].mxu0 }
0x1732   :  { %v928_v12 = vpop.f32.mrb[22].mxu0 }
0x1733   :  { %v2515_v13 = vadd.f32 %v2497_v63, %v2511_v10  ;;  %v2517_v15 = vadd.f32 %v1817_v14, %v928_v12  ;;  %v1987_v16 = vpop.f32.mrb[23].mxu0 }
0x1735   :  { %v992_v30 = vadd.f32 %v986_v1, %v2515_v13 }
0x1737   :  { %v1824_v17 = vmul.f32 -1.442695, %v992_v30 }
0x1739   :  { %2129 = vpow2.f32 %v1824_v17 }
0x1743   :  { %v2130_v18 = vpop.eup %2129 }
0x1744   :  { %v996_v20 = vadd.f32 1.0, %v2130_v18 }
0x1746   :  { %2131 = vrcp.f32 %v996_v20 }
0x1750   :  { %v2132_v23 = vpop.eup %2131 }
0x1751   :  { %v1004_v24 = vmul.f32 %v2132_v23, %v1002_v21  ;;  %v1011_v28 = vsub.f32 1.0, %v2132_v23  ;;  %v1017_v31 = vmul.f32 0.0, %v2132_v23 }
0x1753   :  { %1006 = vrot.lane.b32.xlu1 %v1004_v24, %s2192_s2 }
0x17c5   :  { %v1007_v25 = vpop.permute.xlu1 %1006 }
0x17c6   :  { %v1009_v26 = vadd.f32 %v1007_v25, %v2511_v10 }
0x17c8   :  { %2133 = vtanh.f32 %v1009_v26 }
0x17d2   :  { %v2134_v27 = vpop.eup %2133 }
0x17d3   :  { %1013 = vrot.lane.b32.xlu0 %v2134_v27, %s2193_s4 }
0x1845   :  { %v1014_v29 = vpop.permute.xlu0 %1013 }
0x1846   :  { %v1016_v32 = vmul.f32 %v1014_v29, %v1011_v28 }
0x1848   :  { %v2523_v35 = vadd.f32 %v1017_v31, %v1016_v32 }
0x184a   :  { %v1019_v36 = vpack.c.bf16 %v2523_v35, %v2523_v35  ;;  %v1096_v22 = vrot.slane %v2523_v35, 6 }
0x184c   :  { %1021 = vrot.lane.b32.xlu1 %v1019_v36, %s2193_s4 }
0x18be   :  { %v1022_v37 = vpop.permute.xlu1 %1021 }
0x18bf   :  { %2001 = vmatmul.mubr.msk.bf16.vlgmr.msra.gmra.mrb[24].mxu0 %vm142_vm4, %v1022_v37 }
0x18c0   :  { %2013 = vmatpush3.bf16.msra.mxu0 %v2464_v6  ;;  %2016 = vmatprep.mubr.msk.bf16.mxu0 %vm2190_vm0, %v2189_v0 }
0x18c1   :  { %2014 = vmatprep.subr.bf16.mxu0 %v2189_v0 }
0x18c4   :  { %2015 = vmatpush3.bf16.msra.mxu0 %v2473_v54 }
0x18c5   :  { %2028 = vmatprep.subr.bf16.mxu0 %v2189_v0 }
0x1992   :  { %v1060_v38 = vpop.f32.mrb[24].mxu0 }
0x1993   :  { %v1076_v39 = vadd.f32 %v2497_v63, %v1060_v38  ;;  %v2002_v40 = vpop.f32.mrb[25].mxu0  ;;  %v1067_v45 = vrot.slane %v1060_v38, 6 }
0x1994   :  { %v1063_v42 = vpop.f32.mrb[26].mxu0 }
0x1995   :  { %v1078_v43 = vrot.slane %v1076_v39, 6  ;;  %v2003_v44 = vpop.f32.mrb[27].mxu0  ;;  %v1069_v46 = vadd.f32 %v1067_v45, %v2515_v13 }
0x1997   :  { %1079 = vrot.lane.b32.xlu0 %v1078_v43, %s2192_s2  ;;  %v1826_v41 = vmul.f32 -1.442695, %v1069_v46 }
0x1999   :  { %2135 = vpow2.f32 %v1826_v41 }
0x19a3   :  { %v2136_v47 = vpop.eup %2135 }
0x19a4   :  { %v1073_v48 = vadd.f32 1.0, %v2136_v47 }
0x19a6   :  { %2137 = vrcp.f32 %v1073_v48 }
0x19b0   :  { %v2138_v49 = vpop.eup %2137 }
0x19b1   :  { %v1089_v53 = vsub.f32 1.0, %v2138_v49  ;;  %v1098_v55 = vmul.f32 %v2138_v49, %v1096_v22 }
0x1a09   :  { %v1080_v51 = vpop.permute.xlu0 %1079 }
0x1a0a   :  { %v1082_v5 = vmul.f32 %v2138_v49, %v1080_v51 }
0x1a0c   :  { %1084 = vrot.lane.b32.xlu1 %v1082_v5, %s2192_s2 }
0x1a7e   :  { %v1085_v50 = vpop.permute.xlu1 %1084 }
0x1a7f   :  { %v1087_v52 = vadd.f32 %v1085_v50, %v2511_v10 }
0x1a81   :  { %2139 = vtanh.f32 %v1087_v52 }
0x1a8b   :  { %v2140_v19 = vpop.eup %2139 }
0x1a8c   :  { %1091 = vrot.lane.b32.xlu0 %v2140_v19, %s2193_s4 }
0x1afe   :  { %v1092_v34 = vpop.permute.xlu0 %1091 }
0x1aff   :  { %v1094_v56 = vmul.f32 %v1092_v34, %v1089_v53 }
0x1b01   :  { %v1099_v57 = vadd.f32 %v1098_v55, %v1094_v56 }
0x1b03   :  { %v1100_v58 = vpack.c.bf16 %v1099_v57, %v1099_v57  ;;  %v1178_v21 = vrot.slane %v1099_v57, 6  ;;  %v1587_v27 = vsel %vm845_vm5, %v2523_v35, %v1099_v57 }
0x1b05   :  { %v1102_v59 = vrot.slane %v1100_v58, 1 }
0x1b07   :  { %1103 = vrot.lane.b32.xlu1 %v1102_v59, %s2193_s4 }
0x1b79   :  { %v1104_v60 = vpop.permute.xlu1 %1103 }
0x1b7a   :  { %2009 = vmatmul.mubr.msk.bf16.vlgmr.msra.gmra.mrb[24].mxu1 %vm142_vm4, %v1104_v60 }
0x1b7b   :  { %2021 = vmatpush3.bf16.msra.mxu1 %v2464_v6  ;;  %2024 = vmatprep.mubr.msk.bf16.mxu1 %vm2190_vm0, %v2189_v0 }
0x1b7c   :  { %2022 = vmatprep.subr.bf16.mxu1 %v2189_v0 }
0x1b7f   :  { %2023 = vmatpush3.bf16.msra.mxu1 %v2473_v54 }
0x1b80   :  { %2036 = vmatprep.subr.bf16.mxu1 %v2189_v0 }
0x1c4d   :  { %v1142_v61 = vpop.f32.mrb[24].mxu1 }
0x1c4e   :  { %v1158_v62 = vadd.f32 %v2497_v63, %v1142_v61  ;;  %v2010_v7 = vpop.f32.mrb[25].mxu1  ;;  %v1149_v4 = vrot.slane %v1142_v61, 4 }
0x1c4f   :  { %v1145_v1 = vpop.f32.mrb[26].mxu1 }
0x1c50   :  { %v1160_v2 = vrot.slane %v1158_v62, 4  ;;  %v2011_v3 = vpop.f32.mrb[27].mxu1  ;;  %v1151_v8 = vadd.f32 %v1149_v4, %v2515_v13  ;;  %v2588_v62 = vadd.f32 %v2497_v63, %v2517_v15 }
0x1c52   :  { %1161 = vrot.lane.b32.xlu0 %v1160_v2, %s2192_s2  ;;  %v1828_v9 = vmul.f32 -1.442695, %v1151_v8 }
0x1c54   :  { %2141 = vpow2.f32 %v1828_v9 }
0x1c5e   :  { %v2142_v14 = vpop.eup %2141 }
0x1c5f   :  { %v1155_v33 = vadd.f32 1.0, %v2142_v14 }
0x1c61   :  { %2143 = vrcp.f32 %v1155_v33 }
0x1c6b   :  { %v2144_v11 = vpop.eup %2143 }
0x1c6c   :  { %v1171_v20 = vsub.f32 1.0, %v2144_v11  ;;  %v1180_v24 = vmul.f32 %v2144_v11, %v1178_v21 }
0x1cc4   :  { %v1162_v12 = vpop.permute.xlu0 %1161 }
0x1cc5   :  { %v1164_v16 = vmul.f32 %v2144_v11, %v1162_v12 }
0x1cc7   :  { %1166 = vrot.lane.b32.xlu1 %v1164_v16, %s2192_s2 }
0x1d39   :  { %v1167_v30 = vpop.permute.xlu1 %1166 }
0x1d3a   :  { %v1169_v17 = vadd.f32 %v1167_v30, %v2511_v10 }
0x1d3c   :  { %2145 = vtanh.f32 %v1169_v17 }
0x1d46   :  { %v2146_v18 = vpop.eup %2145 }
0x1d47   :  { %1173 = vrot.lane.b32.xlu0 %v2146_v18, %s2193_s4 }
0x1db9   :  { %v1174_v23 = vpop.permute.xlu0 %1173 }
0x1dba   :  { %v1176_v25 = vmul.f32 %v1174_v23, %v1171_v20 }
0x1dbc   :  { %v1181_v26 = vadd.f32 %v1180_v24, %v1176_v25 }
0x1dbe   :  { %v1588_v28 = vsel %vm847_vm6, %v1587_v27, %v1181_v26  ;;  %v1182_v29 = vpack.c.bf16 %v1181_v26, %v1181_v26  ;;  %v1260_v52 = vrot.slane %v1181_v26, 6 }
0x1dc0   :  { %v1184_v31 = vrot.slane %v1182_v29, 2 }
0x1dc2   :  { %1185 = vrot.lane.b32.xlu1 %v1184_v31, %s2193_s4 }
0x1e34   :  { %v1186_v32 = vpop.permute.xlu1 %1185 }
0x1e35   :  { %2017 = vmatmul.mubr.msk.bf16.vlgmr.msra.gmra.mrb[28].mxu0 %vm142_vm4, %v1186_v32 }
0x1e36   :  { %2029 = vmatpush3.bf16.msra.mxu0 %v2464_v6  ;;  %2032 = vmatprep.mubr.msk.bf16.mxu0 %vm2190_vm0, %v2189_v0 }
0x1e37   :  { %2030 = vmatprep.subr.bf16.mxu0 %v2189_v0 }
0x1e3a   :  { %2031 = vmatpush3.bf16.msra.mxu0 %v2473_v54 }
0x1e3b   :  { %2044 = vmatprep.subr.bf16.mxu0 %v2189_v0 }
0x1f08   :  { %v1224_v35 = vpop.f32.mrb[28].mxu0 }
0x1f09   :  { %v1240_v36 = vadd.f32 %v2497_v63, %v1224_v35  ;;  %v2018_v37 = vpop.f32.mrb[29].mxu0  ;;  %v1231_v42 = vrot.slane %v1224_v35, 2 }
0x1f0a   :  { %v1227_v38 = vpop.f32.mrb[30].mxu0 }
0x1f0b   :  { %v1242_v39 = vrot.slane %v1240_v36, 2  ;;  %v2019_v40 = vpop.f32.mrb[31].mxu0  ;;  %v1233_v43 = vadd.f32 %v1231_v42, %v2515_v13 }
0x1f0d   :  { %1243 = vrot.lane.b32.xlu0 %v1242_v39, %s2192_s2  ;;  %v1830_v44 = vmul.f32 -1.442695, %v1233_v43 }
0x1f0f   :  { %2147 = vpow2.f32 %v1830_v44 }
0x1f19   :  { %v2148_v45 = vpop.eup %2147 }
0x1f1a   :  { %v1237_v46 = vadd.f32 1.0, %v2148_v45 }
0x1f1c   :  { %2149 = vrcp.f32 %v1237_v46 }
0x1f26   :  { %v2150_v41 = vpop.eup %2149 }
0x1f27   :  { %v1253_v50 = vsub.f32 1.0, %v2150_v41  ;;  %v1262_v19 = vmul.f32 %v2150_v41, %v1260_v52 }
0x1f7f   :  { %v1244_v47 = vpop.permute.xlu0 %1243 }
0x1f80   :  { %v1246_v48 = vmul.f32 %v2150_v41, %v1244_v47 }
0x1f82   :  { %1248 = vrot.lane.b32.xlu1 %v1246_v48, %s2192_s2 }
0x1ff4   :  { %v1249_v49 = vpop.permute.xlu1 %1248 }
0x1ff5   :  { %v1251_v51 = vadd.f32 %v1249_v49, %v2511_v10 }
0x1ff7   :  { %2151 = vtanh.f32 %v1251_v51 }
0x2001   :  { %v2152_v5 = vpop.eup %2151 }
0x2002   :  { %1255 = vrot.lane.b32.xlu0 %v2152_v5, %s2193_s4 }
0x2074   :  { %v1256_v13 = vpop.permute.xlu0 %1255 }
0x2075   :  { %v1258_v53 = vmul.f32 %v1256_v13, %v1253_v50 }
0x2077   :  { %v1263_v22 = vadd.f32 %v1262_v19, %v1258_v53 }
0x2079   :  { %v1264_v34 = vpack.c.bf16 %v1263_v22, %v1263_v22  ;;  %v2574_v55 = vsel %vm849_vm7, %v1588_v28, %v1263_v22  ;;  %v1338_v16 = vrot.slane %v1263_v22, 6 }
0x207b   :  { %v1266_v56 = vrot.slane %v1264_v34, 3 }
0x207d   :  { %1267 = vrot.lane.b32.xlu1 %v1266_v56, %s2193_s4 }
0x20ef   :  { %v1268_v57 = vpop.permute.xlu1 %1267 }
0x20f0   :  { %2025 = vmatmul.mubr.msk.bf16.vlgmr.msra.gmra.mrb[28].mxu1 %vm142_vm4, %v1268_v57 }
0x20f1   :  { %2037 = vmatpush3.bf16.msra.mxu1 %v2464_v6  ;;  %2040 = vmatprep.mubr.msk.bf16.mxu1 %vm2190_vm0, %v2189_v0 }
0x20f2   :  { %2038 = vmatprep.subr.bf16.mxu1 %v2189_v0 }
0x20f5   :  { %2039 = vmatpush3.bf16.msra.mxu1 %v2473_v54 }
0x20f6   :  { %2052 = vmatprep.subr.bf16.mxu1 %v2189_v0 }
0x21c3   :  { %v1306_v10 = vpop.f32.mrb[28].mxu1 }
0x21c4   :  { %v1319_v58 = vadd.f32 %v2497_v63, %v1306_v10  ;;  %v2026_v59 = vpop.f32.mrb[29].mxu1  ;;  %v1312_v7 = vadd.f32 %v1306_v10, %v2588_v62 }
0x21c5   :  { %v1309_v60 = vpop.f32.mrb[30].mxu1 }
0x21c6   :  { %1321 = vrot.lane.b32.xlu0 %v1319_v58, %s2192_s2  ;;  %v2027_v61 = vpop.f32.mrb[31].mxu1  ;;  %v1832_v1 = vmul.f32 -1.442695, %v1312_v7 }
0x21c8   :  { %2153 = vpow2.f32 %v1832_v1 }
0x21d2   :  { %v2154_v2 = vpop.eup %2153 }
0x21d3   :  { %v1316_v3 = vadd.f32 1.0, %v2154_v2 }
0x21d5   :  { %2155 = vrcp.f32 %v1316_v3 }
0x21df   :  { %v2156_v4 = vpop.eup %2155 }
0x21e0   :  { %v1331_v12 = vsub.f32 1.0, %v2156_v4  ;;  %v1340_v17 = vmul.f32 %v2156_v4, %v1338_v16 }
0x2238   :  { %v1322_v8 = vpop.permute.xlu0 %1321 }
0x2239   :  { %v1324_v9 = vmul.f32 %v2156_v4, %v1322_v8 }
0x223b   :  { %1326 = vrot.lane.b32.xlu1 %v1324_v9, %s2192_s2 }
0x22ad   :  { %v1327_v14 = vpop.permute.xlu1 %1326 }
0x22ae   :  { %v1329_v33 = vadd.f32 %v1327_v14, %v2517_v15 }
0x22b0   :  { %2157 = vtanh.f32 %v1329_v33 }
0x22ba   :  { %v2158_v11 = vpop.eup %2157 }
0x22bb   :  { %1333 = vrot.lane.b32.xlu0 %v2158_v11, %s2193_s4 }
0x232d   :  { %v1334_v30 = vpop.permute.xlu0 %1333 }
0x232e   :  { %v1336_v18 = vmul.f32 %v1334_v30, %v1331_v12 }
0x2330   :  { %v2594_v20 = vadd.f32 %v1340_v17, %v1336_v18 }
0x2332   :  { %v1342_v21 = vpack.c.bf16 %v2594_v20, %v2594_v20  ;;  %v1419_v44 = vrot.slane %v2594_v20, 6 }
0x2334   :  { %1344 = vrot.lane.b32.xlu1 %v1342_v21, %s2193_s4 }
0x23a6   :  { %v1345_v23 = vpop.permute.xlu1 %1344 }
0x23a7   :  { %2033 = vmatmul.mubr.msk.bf16.vlgmr.msra.gmra.mrb[32].mxu0 %vm142_vm4, %v1345_v23 }
0x23a8   :  { %2045 = vmatpush3.bf16.msra.mxu0 %v2464_v6  ;;  %2048 = vmatprep.mubr.msk.bf16.mxu0 %vm2190_vm0, %v2189_v0 }
0x23a9   :  { %2046 = vmatprep.subr.bf16.mxu0 %v2189_v0 }
0x23ac   :  { %2047 = vmatpush3.bf16.msra.mxu0 %v2473_v54 }
0x247a   :  { %v1383_v24 = vpop.f32.mrb[32].mxu0 }
0x247b   :  { %v1399_v25 = vadd.f32 %v2497_v63, %v1383_v24  ;;  %v2034_v26 = vpop.f32.mrb[33].mxu0  ;;  %v1390_v31 = vrot.slane %v1383_v24, 6 }
0x247c   :  { %v1386_v27 = vpop.f32.mrb[34].mxu0 }
0x247d   :  { %v1401_v28 = vrot.slane %v1399_v25, 6  ;;  %v2035_v29 = vpop.f32.mrb[35].mxu0  ;;  %v1392_v32 = vadd.f32 %v1390_v31, %v2588_v62 }
0x247f   :  { %1402 = vrot.lane.b32.xlu0 %v1401_v28, %s2192_s2  ;;  %v1834_v6 = vmul.f32 -1.442695, %v1392_v32 }
0x2481   :  { %2159 = vpow2.f32 %v1834_v6 }
0x248b   :  { %v2160_v35 = vpop.eup %2159 }
0x248c   :  { %v1396_v36 = vadd.f32 1.0, %v2160_v35 }
0x248e   :  { %2161 = vrcp.f32 %v1396_v36  ;;  %v2079_v36 = vld [vmem:[%s2686_s9] sm:$0xff]  }
0x2498   :  { %v2162_v37 = vpop.eup %2161 }
0x2499   :  { %v1412_v43 = vsub.f32 1.0, %v2162_v37  ;;  %v1421_v46 = vmul.f32 %v2162_v37, %v1419_v44 }
0x24f1   :  { %v1403_v38 = vpop.permute.xlu0 %1402 }
0x24f2   :  { %v1405_v54 = vmul.f32 %v2162_v37, %v1403_v38 }
0x24f4   :  { %1407 = vrot.lane.b32.xlu1 %v1405_v54, %s2192_s2 }
0x2566   :  { %v1408_v39 = vpop.permute.xlu1 %1407 }
0x2567   :  { %v1410_v40 = vadd.f32 %v1408_v39, %v2517_v15 }
0x2569   :  { %2163 = vtanh.f32 %v1410_v40 }
0x2573   :  { %v2164_v42 = vpop.eup %2163 }
0x2574   :  { %1414 = vrot.lane.b32.xlu0 %v2164_v42, %s2193_s4 }
0x25e6   :  { %v1415_v45 = vpop.permute.xlu0 %1414 }
0x25e7   :  { %v1417_v41 = vmul.f32 %v1415_v45, %v1412_v43 }
0x25e9   :  { %v1422_v47 = vadd.f32 %v1421_v46, %v1417_v41 }
0x25eb   :  { %v1423_v48 = vpack.c.bf16 %v1422_v47, %v1422_v47  ;;  %v1501_v3 = vrot.slane %v1422_v47, 6  ;;  %v1590_v33 = vsel %vm845_vm5, %v2594_v20, %v1422_v47  ;;  %v1669_v47 = vld [vmem:[%s2687_s11 + $0x8] sm:$0xff] }
0x25ed   :  { %v1425_v49 = vrot.slane %v1423_v48, 1 }
0x25ef   :  { %1426 = vrot.lane.b32.xlu1 %v1425_v49, %s2193_s4 }
0x2661   :  { %v1427_v51 = vpop.permute.xlu1 %1426 }
0x2662   :  { %2041 = vmatmul.mubr.msk.bf16.vlgmr.msra.gmra.mrb[32].mxu1 %vm142_vm4, %v1427_v51  ;;  %v1671_v51 = vsub.f32 0.0, %v1669_v47 }
0x2663   :  { %2056 = vmatprep.mubr.msk.bf16.mxu1 %vm2190_vm0, %v2189_v0  ;;  %2053 = vmatpush3.bf16.msra.mxu1 %v2079_v36 }
0x2664   :  { %2054 = vmatprep.subr.bf16.mxu1 %v2189_v0  ;;  %v1668_v0 = vld [vmem:[%s2687_s11] sm:$0xff]  ;;  %s2195_s11 = smov 32  }
0x2665   :  { %v1670_v46 = vsub.f32 0.0, %v1668_v0 }
0x2667   :  { %v1672_v41 = vadd.f32 1.0, %v1670_v46  ;;  %v1675_v48 = vmul.f32 -0.5, %v1670_v46 }
0x2735   :  { %v1465_v5 = vpop.f32.mrb[32].mxu1 }
0x2736   :  { %v1481_v50 = vadd.f32 %v2497_v63, %v1465_v5  ;;  %v2042_v52 = vpop.f32.mrb[33].mxu1  ;;  %v1472_v22 = vrot.slane %v1465_v5, 4 }
0x2737   :  { %v1468_v13 = vpop.f32.mrb[34].mxu1 }
0x2738   :  { %v1483_v19 = vrot.slane %v1481_v50, 4  ;;  %v2043_v53 = vpop.f32.mrb[35].mxu1  ;;  %v1474_v34 = vadd.f32 %v1472_v22, %v2588_v62  ;;  %v1676_v22 = vadd.f32 1.0, %v1675_v48 }
0x273a   :  { %1484 = vrot.lane.b32.xlu0 %v1483_v19, %s2192_s2  ;;  %v1836_v56 = vmul.f32 -1.442695, %v1474_v34 }
0x273c   :  { %2165 = vpow2.f32 %v1836_v56  ;;  %v1678_v56 = vand.u32 2147483647, %v1670_v46 }
0x273e   :  { %vm1679_vm8 = vcmp.lt.f32.partialorder %v1678_v56, 0.0004427343 }
0x2746   :  { %v2166_v57 = vpop.eup %2165 }
0x2747   :  { %v1478_v10 = vadd.f32 1.0, %v2166_v57  ;;  %v1681_v57 = vadd.f32 1.0, %v1671_v51 }
0x2749   :  { %2167 = vrcp.f32 %v1478_v10 }
0x2753   :  { %v2168_v58 = vpop.eup %2167 }
0x2754   :  { %v1494_v2 = vsub.f32 1.0, %v2168_v58  ;;  %v1503_v8 = vmul.f32 %v2168_v58, %v1501_v3 }
0x27ac   :  { %v1485_v59 = vpop.permute.xlu0 %1484 }
0x27ad   :  { %v1487_v60 = vmul.f32 %v2168_v58, %v1485_v59 }
0x27af   :  { %1489 = vrot.lane.b32.xlu1 %v1487_v60, %s2192_s2  ;;  %v1677_v60 = vmul.f32 %v1676_v22, %v1670_v46 }
0x2821   :  { %v1490_v61 = vpop.permute.xlu1 %1489 }
0x2822   :  { %v1492_v7 = vadd.f32 %v1490_v61, %v2517_v15 }
0x2824   :  { %2169 = vtanh.f32 %v1492_v7 }
0x282e   :  { %v2170_v1 = vpop.eup %2169 }
0x282f   :  { %1496 = vrot.lane.b32.xlu0 %v2170_v1, %s2193_s4  ;;  %v1684_v1 = vmul.f32 -0.5, %v1671_v51 }
0x28a1   :  { %v1497_v4 = vpop.permute.xlu0 %1496 }
0x28a2   :  { %v1499_v9 = vmul.f32 %v1497_v4, %v1494_v2 }
0x28a4   :  { %v1504_v14 = vadd.f32 %v1503_v8, %v1499_v9 }
0x28a6   :  { %v1591_v11 = vsel %vm847_vm6, %v1590_v33, %v1504_v14  ;;  %v1505_v12 = vpack.c.bf16 %v1504_v14, %v1504_v14  ;;  %v1583_v54 = vrot.slane %v1504_v14, 6  ;;  %v1685_v33 = vadd.f32 1.0, %v1684_v1 }
0x28a8   :  { %v1507_v16 = vrot.slane %v1505_v12, 2 }
0x28aa   :  { %1508 = vrot.lane.b32.xlu1 %v1507_v16, %s2193_s4  ;;  %v1687_v16 = vand.u32 2147483647, %v1671_v51 }
0x28ac   :  { %vm1688_vm9 = vcmp.lt.f32.partialorder %v1687_v16, 0.0004427343 }
0x291c   :  { %v1509_v30 = vpop.permute.xlu1 %1508 }
0x291d   :  { %2049 = vmatmul.mubr.msk.bf16.vlgmr.msra.gmra.mrb[36].mxu0 %vm142_vm4, %v1509_v30 }
0x29f0   :  { %v1547_v17 = vpop.f32.mrb[36].mxu0 }
0x29f1   :  { %v1563_v18 = vadd.f32 %v2497_v63, %v1547_v17  ;;  %v2050_v21 = vpop.f32.mrb[37].mxu0  ;;  %v1554_v26 = vrot.slane %v1547_v17, 2 }
0x29f2   :  { %v1550_v23 = vpop.f32.mrb[38].mxu0  ;;  %v1686_v21 = vmul.f32 %v1685_v33, %v1671_v51 }
0x29f3   :  { %v1565_v24 = vrot.slane %v1563_v18, 2  ;;  %v2051_v25 = vpop.f32.mrb[39].mxu0  ;;  %v1556_v20 = vadd.f32 %v1554_v26, %v2588_v62  ;;  %v2080_v62 = vld [vmem:[%s2686_s9 + $0x8] sm:$0xff]  }
0x29f4   :  { %2055 = vmatpush3.bf16.msra.mxu1 %v2080_v62 }
0x29f5   :  { %1566 = vrot.lane.b32.xlu0 %v1565_v24, %s2192_s2  ;;  %v1838_v27 = vmul.f32 -1.442695, %v1556_v20 }
0x29f7   :  { %2171 = vpow2.f32 %v1838_v27 }
0x2a01   :  { %v2172_v28 = vpop.eup %2171 }
0x2a02   :  { %v1560_v29 = vadd.f32 1.0, %v2172_v28 }
0x2a04   :  { %2173 = vrcp.f32 %v1560_v29 }
0x2a0e   :  { %v2174_v31 = vpop.eup %2173 }
0x2a0f   :  { %v1576_v38 = vsub.f32 1.0, %v2174_v31 }
0x2a67   :  { %v1567_v32 = vpop.permute.xlu0 %1566 }
0x2a68   :  { %v1569_v6 = vmul.f32 %v2174_v31, %v1567_v32 }
0x2a6a   :  { %1571 = vrot.lane.b32.xlu1 %v1569_v6, %s2192_s2 }
0x2adc   :  { %v1572_v63 = vpop.permute.xlu1 %1571 }
0x2add   :  { %v1574_v35 = vadd.f32 %v1572_v63, %v2517_v15  ;;  %v1585_v15 = vmul.f32 %v2174_v31, %v1583_v54 }
0x2adf   :  { %2175 = vtanh.f32 %v1574_v35 }
0x2ae0   :  { %2177 = vlog2.f32 %v1672_v41 }
0x2ae9   :  { %v2176_v37 = vpop.eup %2175 }
0x2aea   :  { %1578 = vrot.lane.b32.xlu0 %v2176_v37, %s2193_s4  ;;  %v2178_v34 = vpop.eup %2177 }
0x2aeb   :  { %v1674_v59 = vmul.f32 0.6931472, %v2178_v34 }
0x2aed   :  { %v1680_v7 = vsel %vm1679_vm8, %v1677_v60, %v1674_v59 }
0x2aee   :  { %v1690_v3 = vsub.f32 0.0, %v1680_v7 }
0x2b5c   :  { %v1579_v39 = vpop.permute.xlu0 %1578 }
0x2b5d   :  { %v1581_v40 = vmul.f32 %v1579_v39, %v1576_v38 }
0x2b5f   :  { %v1586_v42 = vadd.f32 %v1585_v15, %v1581_v40 }
0x2b61   :  { %v1592_v43 = vsel %vm849_vm7, %v1591_v11, %v1586_v42 }
0x2b62   :  { %v1593_v44 = vpack.c.bf16 %v1592_v43, %v2574_v55  ;;  %v1839_v55 = vld [vmem:[%s2688_s10] ss:$0 sm:$0xff]  ;;  %s2194_s10 = smov 16  }
0x2b64   :  { %1606 = vrot.lane.b32.xlu1 %v1593_v44, %s2193_s4 }
0x2bd6   :  { %v1607_v45 = vpop.permute.xlu1 %1606 }
0x2bd7   :  { %2057 = vmatmul.mubr.msk.bf16.vlgmr.msra.gmra.mrb[36].mxu1 %vm142_vm4, %v1607_v45 }
0x2caa   :  { %v1657_v49 = vpop.f32.mrb[36].mxu1 }
0x2cab   :  { %v1658_v5 = vadd.f32 %v1839_v55, %v1657_v49  ;;  %v2058_v50 = vpop.f32.mrb[37].mxu1 }
0x2cac   :  { %v1660_v52 = vpop.f32.mrb[38].mxu1 }
0x2cad   :  { %v1664_v13 = vmul.f32 1.442695, %v1658_v5  ;;  %v1692_v19 = vsub.f32 0.0, %v1658_v5  ;;  %v2059_v53 = vpop.f32.mrb[39].mxu1  ;;  %v1661_v58 = vadd.f32 %v1839_v55, %v1660_v52 }
0x2caf   :  { %2179 = vpow2.f32 %v1664_v13  ;;  %v1694_v10 = vmul.f32 1.442695, %v1692_v19  ;;  %v1693_v61 = vsub.f32 0.0, %v1661_v58  ;;  %v1666_v2 = vmul.f32 1.442695, %v1661_v58 }
0x2cb1   :  { %2181 = vpow2.f32 %v1694_v10  ;;  %v1696_v8 = vmul.f32 1.442695, %v1693_v61 }
0x2cb2   :  { %2183 = vlog2.f32 %v1681_v57 }
0x2cb3   :  { %2185 = vpow2.f32 %v1666_v2 }
0x2cb4   :  { %2187 = vpow2.f32 %v1696_v8 }
0x2cb9   :  { %v2180_v4 = vpop.eup %2179 }
0x2cba   :  { %v1743_v9 = vrot.slane %v2180_v4, 2  ;;  %v1747_v17 = vrot.slane %v2180_v4, 4  ;;  %v1751_v24 = vrot.slane %v2180_v4, 6 }
0x2cbb   :  { %v2182_v14 = vpop.eup %2181 }
0x2cbc   :  { %v2184_v11 = vpop.eup %2183  ;;  %1744 = vrot.lane.b32.xlu1 %v1743_v9, %s2194_s10  ;;  %v1698_v12 = vmul.f32 %v2182_v14, %v1690_v3 }
0x2cbd   :  { %v1683_v18 = vmul.f32 0.6931472, %v2184_v11  ;;  %v2186_v26 = vpop.eup %2185 }
0x2cbe   :  { %v1701_v30 = vrot.slane %v1698_v12, 2  ;;  %v1705_v23 = vrot.slane %v1698_v12, 4  ;;  %v1709_v20 = vrot.slane %v1698_v12, 6  ;;  %v2188_v28 = vpop.eup %2187  ;;  %v1759_v31 = vrot.slane %v2186_v26, 2 }
0x2cbf   :  { %v1689_v25 = vsel %vm1688_vm9, %v1686_v21, %v1683_v18  ;;  %v1763_v6 = vrot.slane %v2186_v26, 4  ;;  %v1767_v35 = vrot.slane %v2186_v26, 6 }
0x2cc0   :  { %1702 = vrot.lane.b32.xlu0 %v1701_v30, %s2194_s10  ;;  %1748 = vrot.lane.b32.xlu1 %v1747_v17, %s2195_s11  ;;  %v1691_v27 = vsub.f32 0.0, %v1689_v25 }
0x2cc2   :  { %v1699_v29 = vmul.f32 %v2188_v28, %v1691_v27 }
0x2cc4   :  { %1706 = vrot.lane.b32.xlu0 %v1705_v23, %s2195_s11  ;;  %1752 = vrot.lane.b32.xlu1 %v1751_v24, %s2196_s23  ;;  %v1717_v32 = vrot.slane %v1699_v29, 2  ;;  %v1721_v63 = vrot.slane %v1699_v29, 4  ;;  %v1725_v36 = vrot.slane %v1699_v29, 6 }
0x2cc8   :  { %1710 = vrot.lane.b32.xlu0 %v1709_v20, %s2196_s23  ;;  %1756 = vrot.lane.b32.xlu1 %v2186_v26, %s2192_s2 }
0x2ccc   :  { %1714 = vrot.lane.b32.xlu0 %v1699_v29, %s2192_s2  ;;  %1760 = vrot.lane.b32.xlu1 %v1759_v31, %s2197_s3 }
0x2cd0   :  { %1718 = vrot.lane.b32.xlu0 %v1717_v32, %s2197_s3  ;;  %1764 = vrot.lane.b32.xlu1 %v1763_v6, %s2193_s4 }
0x2cd4   :  { %1722 = vrot.lane.b32.xlu0 %v1721_v63, %s2193_s4  ;;  %1768 = vrot.lane.b32.xlu1 %v1767_v35, %s2198_s24 }
0x2cd8   :  { %1726 = vrot.lane.b32.xlu0 %v1725_v36, %s2198_s24 }
0x2d2e   :  { %v1745_v62 = vpop.permute.xlu1 %1744 }
0x2d2f   :  { %v1771_v44 = vsel %vm62_vm1, %v2180_v4, %v1745_v62 }
0x2d32   :  { %v1703_v37 = vpop.permute.xlu0 %1702  ;;  %v1749_v38 = vpop.permute.xlu1 %1748 }
0x2d33   :  { %v1772_v45 = vsel %vm142_vm4, %v1771_v44, %v1749_v38  ;;  %v1729_v55 = vsel %vm62_vm1, %v1698_v12, %v1703_v37 }
0x2d36   :  { %v1707_v54 = vpop.permute.xlu0 %1706  ;;  %v1753_v39 = vpop.permute.xlu1 %1752 }
0x2d37   :  { %v1773_v41 = vsel %vm1731_vm10, %v1772_v45, %v1753_v39  ;;  %v1730_v49 = vsel %vm142_vm4, %v1729_v55, %v1707_v54 }
0x2d3a   :  { %v1711_v15 = vpop.permute.xlu0 %1710  ;;  %v1757_v40 = vpop.permute.xlu1 %1756 }
0x2d3b   :  { %v1774_v47 = vsel %vm1733_vm11, %v1773_v41, %v1757_v40  ;;  %v1732_v52 = vsel %vm1731_vm10, %v1730_v49, %v1711_v15 }
0x2d3e   :  { %v1715_v42 = vpop.permute.xlu0 %1714  ;;  %v1761_v43 = vpop.permute.xlu1 %1760 }
0x2d3f   :  { %v1775_v48 = vsel %vm1735_vm12, %v1774_v47, %v1761_v43  ;;  %v1734_v19 = vsel %vm1733_vm11, %v1732_v52, %v1715_v42 }
0x2d42   :  { %v1719_v0 = vpop.permute.xlu0 %1718  ;;  %v1765_v46 = vpop.permute.xlu1 %1764 }
0x2d43   :  { %v1776_v51 = vsel %vm1737_vm13, %v1775_v48, %v1765_v46  ;;  %v1736_v53 = vsel %vm1735_vm12, %v1734_v19, %v1719_v0 }
0x2d46   :  { %v1723_v5 = vpop.permute.xlu0 %1722  ;;  %v1769_v50 = vpop.permute.xlu1 %1768 }
0x2d47   :  { %v1777_v13 = vsel %vm1739_vm14, %v1776_v51, %v1769_v50  ;;  %v1738_v22 = vsel %vm1737_vm13, %v1736_v53, %v1723_v5 }
0x2d48   :  { %1778 = vst [vmem:[%s2689_s13] sm:$0x3] %v1777_v13 }
0x2d4a   :  { %v1727_v34 = vpop.permute.xlu0 %1726 }
0x2d4b   :  { %v1740_v56 = vsel %vm1739_vm14, %v1738_v22, %v1727_v34 }
0x2d4c   :  { %1741 = vst [vmem:[%s2690_s12] sm:$0x3] %v1740_v56 }

</bundles_post_ra>
